<compile_context>
chip_gen: v6e
topology: v6e:2x2x1
jax: 0.10.0
libtpu: 0.0.40
codegen_flags: <defaults>
</compile_context>

<pallas_src>
import functools

import jax
import jax.numpy as jnp
import numpy as np
from jax.experimental import pallas as pl
from jax.experimental.pallas import tpu as pltpu

TILE_N = 256    # dst-node rows per aggregation tile (parallel grid axis)
TILE_E = 1024   # edges per tile (data-dependent sequential axis)
TILE_R = 512    # node rows per tile for elementwise/matmul kernels

assert TILE_R % TILE_N == 0


def _round_up(x, m):
    return (x + m - 1) // m * m


# ---------------------------------------------------------------------------
# Pallas kernels
# ---------------------------------------------------------------------------
def _l2norm_linear_kernel(x_ref, w_ref, b_ref, o_ref):
    """Fused F.normalize(p=2, dim=-1) + Linear.  x:[TR,F] f32, w:[F,C] bf16."""
    x = x_ref[...]
    nrm = jnp.sqrt(jnp.sum(x * x, axis=-1, keepdims=True))
    xn = x / jnp.maximum(nrm, 1e-12)
    o_ref[...] = jnp.dot(xn.astype(jnp.bfloat16), w_ref[...],
                         preferred_element_type=jnp.float32) + b_ref[...]


def _conv_ln_relu_kernel(n_et, *refs):
    """Fused per-dst-node-type NGCF layer with segment-sum aggregation.

    grid = (dst_tiles [parallel], local edge tiles [arbitrary]);
    refs = [first_t, num_t]*n_et (SMEM scalar prefetch),
           [xj, xi, dst_ids, W, b]*n_et, gamma, beta | out | acc.

      msg = LeakyReLU((xj * xi) @ W + b)        (f32 product, bf16 MXU, f32 acc)
      acc += onehot(dst == rows) @ msg          (only edge tiles owned by this
                                                 dst tile are visited)
    finalize (last e): LayerNorm(mode='node') + ReLU.
    """
    sched = refs[:2 * n_et]
    data = refs[2 * n_et:7 * n_et]
    gamma_ref = refs[7 * n_et]
    beta_ref = refs[7 * n_et + 1]
    out_ref = refs[7 * n_et + 2]
    acc_ref = refs[7 * n_et + 3]

    n = pl.program_id(0)
    e = pl.program_id(1)
    tile_n, _ = acc_ref.shape
    tile_e = data[0].shape[0]

    @pl.when(e == 0)
    def _init():
        acc_ref[...] = jnp.zeros_like(acc_ref)

    row_ids = n * tile_n + jax.lax.broadcasted_iota(jnp.int32, (tile_n, tile_e), 0)

    for t in range(n_et):
        xj_ref, xi_ref, dst_ref, w_ref, b_ref = data[5 * t:5 * t + 5]
        num_ref = sched[2 * t + 1]

        @pl.when(e < num_ref[n])
        def _accumulate(xj_ref=xj_ref, xi_ref=xi_ref, dst_ref=dst_ref,
                        w_ref=w_ref, b_ref=b_ref):
            prod = xj_ref[...] * xi_ref[...]                               # f32
            m = jnp.dot(prod.astype(jnp.bfloat16), w_ref[...],
                        preferred_element_type=jnp.float32) + b_ref[...]
            m = jnp.where(m >= 0.0, m, 0.01 * m)                           # LeakyReLU
            onehot = (dst_ref[...] == row_ids).astype(jnp.float32)         # [TN,TE]
            acc_ref[...] += jnp.dot(onehot, m,
                                    preferred_element_type=jnp.float32)

    @pl.when(e == pl.num_programs(1) - 1)
    def _finalize():
        acc = acc_ref[...]
        mean = jnp.mean(acc, axis=-1, keepdims=True)
        var = jnp.mean(jnp.square(acc - mean), axis=-1, keepdims=True)
        y = (acc - mean) * jax.lax.rsqrt(var + 1e-5)
        y = y * gamma_ref[...] + beta_ref[...]
        out_ref[...] = jnp.maximum(y, 0.0)


def _heads_kernel(x_ref, w1_ref, b1_ref, w2_ref, b2_ref, emb_ref, pred_ref):
    """Fused l2-normalize + 3x(Linear->ReLU->Linear->Sigmoid) heads as one
    prediction slab (cols: [churn | category | sku])."""
    x = x_ref[...]
    nrm = jnp.sqrt(jnp.sum(x * x, axis=-1, keepdims=True))
    u = x / jnp.maximum(nrm, 1e-12)
    emb_ref[...] = u
    h = jnp.dot(u.astype(jnp.bfloat16), w1_ref[...],
                preferred_element_type=jnp.float32) + b1_ref[...]
    h = jnp.maximum(h, 0.0)
    z = jnp.dot(h.astype(jnp.bfloat16), w2_ref[...],
                preferred_element_type=jnp.float32) + b2_ref[...]
    pred_ref[...] = 1.0 / (1.0 + jnp.exp(-z))


# ---------------------------------------------------------------------------
# Index maps (scalar-prefetch driven, data-dependent edge-tile selection)
# ---------------------------------------------------------------------------
def _const_map(n, e, *s):
    return (0, 0)


def _edge_row_map(t):
    def index_map(n, e, *s):
        first, num = s[2 * t][n], s[2 * t + 1][n]
        return (first + jnp.maximum(jnp.minimum(e, num - 1), 0), 0)
    return index_map


def _edge_col_map(t):
    def index_map(n, e, *s):
        first, num = s[2 * t][n], s[2 * t + 1][n]
        return (0, first + jnp.maximum(jnp.minimum(e, num - 1), 0))
    return index_map


# ---------------------------------------------------------------------------
# Wrappers (pallas_call launches)
# ---------------------------------------------------------------------------
def l2norm_linear(x_pad, p):
    n_pad, f = x_pad.shape
    c = p["w"].shape[1]
    return pl.pallas_call(
        _l2norm_linear_kernel,
        out_shape=jax.ShapeDtypeStruct((n_pad, c), jnp.float32),
        grid=(n_pad // TILE_R,),
        in_specs=[pl.BlockSpec((TILE_R, f), lambda i: (i, 0)),
                  pl.BlockSpec((f, c), lambda i: (0, 0)),
                  pl.BlockSpec((1, c), lambda i: (0, 0))],
        out_specs=pl.BlockSpec((TILE_R, c), lambda i: (i, 0)),
        compiler_params=pltpu.CompilerParams(dimension_semantics=("parallel",)),
    )(x_pad, p["w"], p["b"])


def conv_ln_relu(x, ets, plans, conv_params, norm_p, n_pad_dst):
    n_et = len(ets)
    c = norm_p["g"].shape[1]
    max_e = max(plans[et]["max_tiles"] for et in ets)

    prefetch, inputs, in_specs = [], [], []
    for et in ets:
        prefetch += [plans[et]["first"], plans[et]["num"]]
    for t, et in enumerate(ets):
        src_t, _, dst_t = et
        pln = plans[et]
        # per-edge row gathers stay in XLA (data-dependent); dst-sorted order,
        # real channel width (no lane zero-padding of HBM edge tensors).
        xj = jnp.take(x[src_t], pln["src_idx"], axis=0)   # [E_pad, C] f32
        xi = jnp.take(x[dst_t], pln["dst_idx"], axis=0)   # [E_pad, C] f32
        p = conv_params[et]
        inputs += [xj, xi, pln["dst_ids"], p["w"], p["b"]]
        in_specs += [
            pl.BlockSpec((TILE_E, c), _edge_row_map(t)),
            pl.BlockSpec((TILE_E, c), _edge_row_map(t)),
            pl.BlockSpec((1, TILE_E), _edge_col_map(t)),
            pl.BlockSpec((c, c), _const_map),
            pl.BlockSpec((1, c), _const_map),
        ]
    inputs += [norm_p["g"], norm_p["b"]]
    in_specs += [pl.BlockSpec((1, c), _const_map),
                 pl.BlockSpec((1, c), _const_map)]

    return pl.pallas_call(
        functools.partial(_conv_ln_relu_kernel, n_et),
        out_shape=jax.ShapeDtypeStruct((n_pad_dst, c), jnp.float32),
        grid_spec=pltpu.PrefetchScalarGridSpec(
            num_scalar_prefetch=2 * n_et,
            grid=(n_pad_dst // TILE_N, max_e),
            in_specs=in_specs,
            out_specs=pl.BlockSpec((TILE_N, c), lambda n, e, *s: (n, 0)),
            scratch_shapes=[pltpu.VMEM((TILE_N, c), jnp.float32)]),
        compiler_params=pltpu.CompilerParams(
            dimension_semantics=("parallel", "arbitrary")),
    )(*prefetch, *inputs)


def heads_fused(x_client_pad, hp):
    n_pad, c = x_client_pad.shape
    hid3 = hp["w1"].shape[1]
    n_pred = hp["w2"].shape[1]
    return pl.pallas_call(
        _heads_kernel,
        out_shape=(jax.ShapeDtypeStruct((n_pad, c), jnp.float32),
                   jax.ShapeDtypeStruct((n_pad, n_pred), jnp.float32)),
        grid=(n_pad // TILE_R,),
        in_specs=[pl.BlockSpec((TILE_R, c), lambda i: (i, 0)),
                  pl.BlockSpec((c, hid3), lambda i: (0, 0)),
                  pl.BlockSpec((1, hid3), lambda i: (0, 0)),
                  pl.BlockSpec((hid3, n_pred), lambda i: (0, 0)),
                  pl.BlockSpec((1, n_pred), lambda i: (0, 0))],
        out_specs=(pl.BlockSpec((TILE_R, c), lambda i: (i, 0)),
                   pl.BlockSpec((TILE_R, n_pred), lambda i: (i, 0))),
        compiler_params=pltpu.CompilerParams(dimension_semantics=("parallel",)),
    )(x_client_pad, hp["w1"], hp["b1"], hp["w2"], hp["b2"])


# ---------------------------------------------------------------------------
# Host-side edge scheduling (sort by dst; per-dst-tile edge-tile ranges)
# ---------------------------------------------------------------------------
def build_edge_plans(edge_index_dict, edge_types, n_pad):
    plans = {}
    for et in edge_types:
        _, _, dst_t = et
        ei = np.asarray(edge_index_dict[et])
        src = ei[0].astype(np.int32)
        dst = ei[1].astype(np.int32)
        n_e = int(dst.shape[0])
        order = np.argsort(dst, kind="stable")
        src_s, dst_s = src[order], dst[order]

        e_pad = max(TILE_E, _round_up(n_e, TILE_E))
        src_idx = np.zeros((e_pad,), np.int32)
        dst_idx = np.zeros((e_pad,), np.int32)
        dst_ids = np.full((1, e_pad), -1, np.int32)   # -1 => padded edge, no match
        src_idx[:n_e] = src_s
        dst_idx[:n_e] = dst_s
        dst_ids[0, :n_e] = dst_s

        n_tiles = n_pad[dst_t] // TILE_N
        bounds = np.searchsorted(dst_s, np.arange(n_tiles + 1) * TILE_N).astype(np.int64)
        first = bounds[:-1] // TILE_E
        last = -(-bounds[1:] // TILE_E)                # ceil division
        num = np.where(bounds[1:] > bounds[:-1], last - first, 0)
        first = np.where(num > 0, first, 0)

        plans[et] = {
            "src_idx": jnp.asarray(src_idx),
            "dst_idx": jnp.asarray(dst_idx),
            "dst_ids": jnp.asarray(dst_ids),
            "first": jnp.asarray(first.astype(np.int32)),
            "num": jnp.asarray(num.astype(np.int32)),
            "max_tiles": int(max(1, int(num.max()) if num.size else 1)),
        }
    return plans


# ---------------------------------------------------------------------------
# Parameter init (torch layout) and one-time preparation for the kernels
# ---------------------------------------------------------------------------
def _init_linear(key, din, dout):
    k1, k2 = jax.random.split(key)
    bound = 1.0 / float(np.sqrt(din))
    return {"w": jax.random.uniform(k1, (dout, din), jnp.float32, -bound, bound),
            "b": jax.random.uniform(k2, (dout,), jnp.float32, -bound, bound)}


def init_params(key, node_feat_dims, channels, num_layers, num_categories,
                num_skus, node_types, edge_types):
    params = {"lin_initial": {}, "convs": [], "norms": [], "heads": {}}
    keys = iter(jax.random.split(key, 64))
    for nt in node_types:
        params["lin_initial"][nt] = _init_linear(next(keys), node_feat_dims[nt], channels)
    for _ in range(num_layers):
        params["convs"].append({et: _init_linear(next(keys), channels, channels)
                                for et in edge_types})
        params["norms"].append({nt: {"g": jnp.ones((channels,), jnp.float32),
                                     "b": jnp.zeros((channels,), jnp.float32)}
                                for nt in node_types})
    params["heads"]["churn"] = [_init_linear(next(keys), channels, 64),
                                _init_linear(next(keys), 64, 1)]
    params["heads"]["category"] = [_init_linear(next(keys), channels, 64),
                                   _init_linear(next(keys), 64, num_categories)]
    params["heads"]["sku"] = [_init_linear(next(keys), channels, 64),
                              _init_linear(next(keys), 64, num_skus)]
    return params


def _prep_linear(p):
    return {"w": jnp.asarray(p["w"]).T.astype(jnp.bfloat16),
            "b": jnp.asarray(p["b"]).reshape(1, -1).astype(jnp.float32)}


def prepare_params(params, node_types, edge_types, num_layers, channels,
                   num_categories, num_skus):
    """Pre-transpose to [Din,Dout], pre-cast matmul weights to bf16 once, and
    concatenate the three heads into one fused (block-diagonal) head."""
    prep = {"lin_initial": {}, "convs": [], "norms": [], "heads": {}}
    for nt in node_types:
        prep["lin_initial"][nt] = _prep_linear(params["lin_initial"][nt])
    for layer in range(num_layers):
        prep["convs"].append({et: _prep_linear(params["convs"][layer][et])
                              for et in edge_types})
        prep["norms"].append(
            {nt: {"g": params["norms"][layer][nt]["g"].reshape(1, -1),
                  "b": params["norms"][layer][nt]["b"].reshape(1, -1)}
             for nt in node_types})
    hid = 64
    hid3 = 3 * hid
    n_pred = 1 + num_categories + num_skus
    w1 = np.zeros((channels, hid3), np.float32)
    b1 = np.zeros((1, hid3), np.float32)
    w2 = np.zeros((hid3, n_pred), np.float32)
    b2 = np.zeros((1, n_pred), np.float32)
    col = 0
    for i, (name, nout) in enumerate(zip(("churn", "category", "sku"),
                                         (1, num_categories, num_skus))):
        p1, p2 = params["heads"][name]
        w1[:, i * hid:(i + 1) * hid] = np.asarray(p1["w"]).T
        b1[0, i * hid:(i + 1) * hid] = np.asarray(p1["b"])
        w2[i * hid:(i + 1) * hid, col:col + nout] = np.asarray(p2["w"]).T
        b2[0, col:col + nout] = np.asarray(p2["b"])
        col += nout
    prep["heads"] = {"w1": jnp.asarray(w1, jnp.bfloat16), "b1": jnp.asarray(b1),
                     "w2": jnp.asarray(w2, jnp.bfloat16), "b2": jnp.asarray(b2)}
    return prep


# ---------------------------------------------------------------------------
# Full forward pass (Pallas)
# ---------------------------------------------------------------------------
def full_ngcf_forward(prep, x_dict, edge_index_dict, node_types, edge_types,
                      num_layers, channels, num_categories, num_skus):
    n_real = {nt: x_dict[nt].shape[0] for nt in node_types}
    n_pad = {nt: _round_up(n_real[nt], TILE_R) for nt in node_types}

    # initial: fused F.normalize + Linear projection (rows zero-padded)
    x = {}
    for nt in node_types:
        feat = x_dict[nt].astype(jnp.float32)
        xp = jnp.zeros((n_pad[nt], feat.shape[1]), jnp.float32).at[:n_real[nt]].set(feat)
        x[nt] = l2norm_linear(xp, prep["lin_initial"][nt])

    # host-side schedule: dst-sorted edges + per-dst-tile edge-tile ranges
    plans = build_edge_plans(edge_index_dict, edge_types, n_pad)
    edges_by_dst = {}
    for et in edge_types:
        edges_by_dst.setdefault(et[2], []).append(et)

    # encoder: fused {NGCF messages + HeteroConv 'sum' + LayerNorm + ReLU}
    for layer in range(num_layers):
        new_x = {}
        for dst_t, ets in edges_by_dst.items():
            new_x[dst_t] = conv_ln_relu(x, ets, plans,
                                        prep["convs"][layer],
                                        prep["norms"][layer][dst_t],
                                        n_pad[dst_t])
        x = new_x

    # fused heads
    emb_pad, preds = heads_fused(x["client"], prep["heads"])
    nc = n_real["client"]
    churn = preds[:nc, 0:1]
    category = preds[:nc, 1:1 + num_categories]
    sku = preds[:nc, 1 + num_categories:1 + num_categories + num_skus]
    user_emb = emb_pad[:nc, :channels]
    return churn, category, sku, user_emb


# ---------------------------------------------------------------------------
# Pure-JAX f32 reference (for correctness check)
# ---------------------------------------------------------------------------
def ref_forward(params, x_dict, edge_index_dict, node_types, edge_types, num_layers):
    def l2n(v):
        return v / jnp.maximum(jnp.linalg.norm(v, axis=-1, keepdims=True), 1e-12)

    def lin(v, p, act="none"):
        y = v @ p["w"].T + p["b"]
        if act == "relu":
            y = jnp.maximum(y, 0.0)
        elif act == "sigmoid":
            y = jax.nn.sigmoid(y)
        return y

    x = {nt: lin(l2n(x_dict[nt]), params["lin_initial"][nt]) for nt in node_types}
    for layer in range(num_layers):
        out = {}
        for et in edge_types:
            src_t, _, dst_t = et
            p = params["convs"][layer][et]
            ei = edge_index_dict[et]
            m = (x[src_t][ei[0]] * x[dst_t][ei[1]]) @ p["w"].T + p["b"]
            m = jnp.where(m >= 0.0, m, 0.01 * m)
            agg = jnp.zeros((x[dst_t].shape[0], m.shape[1]), jnp.float32).at[ei[1]].add(m)
            out[dst_t] = agg if dst_t not in out else out[dst_t] + agg
        nx = {}
        for nt, feat in out.items():
            mean = jnp.mean(feat, axis=-1, keepdims=True)
            var = jnp.mean(jnp.square(feat - mean), axis=-1, keepdims=True)
            y = (feat - mean) * jax.lax.rsqrt(var + 1e-5)
            y = y * params["norms"][layer][nt]["g"] + params["norms"][layer][nt]["b"]
            nx[nt] = jnp.maximum(y, 0.0)
        x = nx
    user_emb = l2n(x["client"])

    def head(p, emb):
        return lin(lin(emb, p[0], "relu"), p[1], "sigmoid")

    return (head(params["heads"]["churn"], user_emb),
            head(params["heads"]["category"], user_emb),
            head(params["heads"]["sku"], user_emb),
            user_emb)


# ---------------------------------------------------------------------------
if __name__ == "__main__":
    key = jax.random.PRNGKey(0)
    keys = jax.random.split(key, 8)

    node_types = ["client", "product"]
    edge_types = [("client", "buys", "product"),
                  ("product", "rev_buys", "client"),
                  ("client", "views", "product"),
                  ("product", "rev_views", "client")]
    channels = 32
    num_layers = 2
    num_categories = 6
    num_skus = 10
    n_client, n_product = 300, 700
    f_client, f_product = 12, 20
    n_buys, n_views = 3000, 1200

    x_dict = {
        "client": jax.random.normal(keys[0], (n_client, f_client), jnp.float32),
        "product": jax.random.normal(keys[1], (n_product, f_product), jnp.float32),
    }
    buys_src = jax.random.randint(keys[2], (n_buys,), 0, n_client, dtype=jnp.int32)
    buys_dst = jax.random.randint(keys[3], (n_buys,), 0, n_product, dtype=jnp.int32)
    views_src = jax.random.randint(keys[4], (n_views,), 0, n_client, dtype=jnp.int32)
    views_dst = jax.random.randint(keys[5], (n_views,), 0, n_product, dtype=jnp.int32)
    edge_index_dict = {
        ("client", "buys", "product"): jnp.stack([buys_src, buys_dst]),
        ("product", "rev_buys", "client"): jnp.stack([buys_dst, buys_src]),
        ("client", "views", "product"): jnp.stack([views_src, views_dst]),
        ("product", "rev_views", "client"): jnp.stack([views_dst, views_src]),
    }

    params = init_params(keys[6], {"client": f_client, "product": f_product},
                         channels, num_layers, num_categories, num_skus,
                         node_types, edge_types)
    prep = prepare_params(params, node_types, edge_types, num_layers,
                          channels, num_categories, num_skus)

    churn, category, sku, user_emb = full_ngcf_forward(
        prep, x_dict, edge_index_dict, node_types, edge_types, num_layers,
        channels, num_categories, num_skus)
    jax.block_until_ready((churn, category, sku, user_emb))

    assert churn.shape == (n_client, 1)
    assert category.shape == (n_client, num_categories)
    assert sku.shape == (n_client, num_skus)
    assert user_emb.shape == (n_client, channels)

    r_churn, r_category, r_sku, r_emb = ref_forward(
        params, x_dict, edge_index_dict, node_types, edge_types, num_layers)
    # kernel uses bf16 MXU operands (f32 accumulate); reference is pure f32
    tol = dict(rtol=2.5e-2, atol=2.5e-2)
    np.testing.assert_allclose(np.asarray(churn), np.asarray(r_churn), **tol)
    np.testing.assert_allclose(np.asarray(category), np.asarray(r_category), **tol)
    np.testing.assert_allclose(np.asarray(sku), np.asarray(r_sku), **tol)
    np.testing.assert_allclose(np.asarray(user_emb), np.asarray(r_emb), **tol)

    print("KERNEL_OK")
</pallas_src>

<mosaic_0001>
module attributes {stable_mosaic.version = 11 : i64} {
  func.func @_l2norm_linear_kernel(%arg0: i32, %arg1: memref<512x12xf32, #tpu.memory_space<vmem>>, %arg2: memref<12x32xbf16, #tpu.memory_space<vmem>>, %arg3: memref<1x32xf32, #tpu.memory_space<vmem>>, %arg4: memref<512x32xf32, #tpu.memory_space<vmem>>) attributes {dimension_semantics = [#tpu.dimension_semantics<parallel>], iteration_bounds = array<i64: 1>, scalar_prefetch = 0 : i64, scratch_operands = 0 : i64, tpu.core_type = #tpu.core_type<tc>, window_params = [{transform_indices = @transform_0, window_bounds = array<i64: 512, 12>}, {pipeline_mode = #tpu.pipeline_mode<synchronous>, transform_indices = @transform_1, window_bounds = array<i64: 12, 32>}, {pipeline_mode = #tpu.pipeline_mode<synchronous>, transform_indices = @transform_2, window_bounds = array<i64: 1, 32>}, {transform_indices = @transform_3, window_bounds = array<i64: 512, 32>}]} {
    %c0 = arith.constant 0 : index
    %c0_0 = arith.constant 0 : index
    %0 = vector.load %arg1[%c0, %c0_0] : memref<512x12xf32, #tpu.memory_space<vmem>>, vector<512x12xf32>
    %1 = arith.mulf %0, %0 : vector<512x12xf32>
    %cst = arith.constant dense<0.000000e+00> : vector<512xf32>
    %2 = vector.multi_reduction <add>, %1, %cst [1] : vector<512x12xf32> to vector<512xf32>
    %3 = vector.shape_cast %2 : vector<512xf32> to vector<512x1xf32>
    %4 = math.sqrt %3 : vector<512x1xf32>
    %cst_1 = arith.constant 9.99999996E-13 : f32
    %5 = vector.broadcast %cst_1 : f32 to vector<512x1xf32>
    %6 = arith.maximumf %4, %5 : vector<512x1xf32>
    %7 = vector.broadcast %6 : vector<512x1xf32> to vector<512x12xf32>
    %8 = arith.divf %0, %7 : vector<512x12xf32>
    %9 = arith.truncf %8 : vector<512x12xf32> to vector<512x12xbf16>
    %c0_2 = arith.constant 0 : index
    %c0_3 = arith.constant 0 : index
    %10 = vector.load %arg2[%c0_2, %c0_3] : memref<12x32xbf16, #tpu.memory_space<vmem>>, vector<12x32xbf16>
    %cst_4 = arith.constant dense<0.000000e+00> : vector<512x32xf32>
    %11 = tpu.matmul %9, %10, %cst_4 {dimension_numbers = #tpu.dot_dimension_numbers<[1], [0], [0], [1], [0, 0, 1, 1], [], []>} : vector<512x12xbf16>, vector<12x32xbf16>, vector<512x32xf32> -> vector<512x32xf32>
    %c0_5 = arith.constant 0 : index
    %c0_6 = arith.constant 0 : index
    %12 = vector.load %arg3[%c0_5, %c0_6] : memref<1x32xf32, #tpu.memory_space<vmem>>, vector<1x32xf32>
    %13 = vector.broadcast %12 : vector<1x32xf32> to vector<512x32xf32>
    %14 = arith.addf %11, %13 : vector<512x32xf32>
    %c0_7 = arith.constant 0 : index
    %c0_8 = arith.constant 0 : index
    %15 = vector.load %arg4[%c0_7, %c0_8] : memref<512x32xf32, #tpu.memory_space<vmem>>, vector<512x32xf32>
    tpu.vector_store %arg4[%c0_7, %c0_8], %14 {strides = array<i32>} : memref<512x32xf32, #tpu.memory_space<vmem>>, vector<512x32xf32>,
    return
  }
  func.func @transform_0(%arg0: i32) -> (i32, i32) {
    %c0_i32 = arith.constant 0 : i32
    %c0_i32_0 = arith.constant 0 : i32
    return %arg0, %c0_i32 : i32, i32
  }
  func.func @transform_1(%arg0: i32) -> (i32, i32) {
    %c0_i32 = arith.constant 0 : i32
    %c0_i32_0 = arith.constant 0 : i32
    %c0_i32_1 = arith.constant 0 : i32
    return %c0_i32, %c0_i32_0 : i32, i32
  }
  func.func @transform_2(%arg0: i32) -> (i32, i32) {
    %c0_i32 = arith.constant 0 : i32
    %c0_i32_0 = arith.constant 0 : i32
    %c0_i32_1 = arith.constant 0 : i32
    return %c0_i32, %c0_i32_0 : i32, i32
  }
  func.func @transform_3(%arg0: i32) -> (i32, i32) {
    %c0_i32 = arith.constant 0 : i32
    %c0_i32_0 = arith.constant 0 : i32
    return %arg0, %c0_i32 : i32, i32
  }
}

</mosaic_0001>

<bundles_post_ra>
// kernel: tpu_custom_call.1
= control target key start
LH: loop header
LB: loop body
LE: loop exit
PB: predicated region body
PF: predicated region fallthrough
CT: control target
= control target key end

     0   :  { %vm143_vm0 = vcmask 97280   ;;  %vm1118_vm1 = vcmask 1045504   ;;  %s3518_s0 = inlined_call_operand.vmem [shape: f32[512,12], index: 0, kind: input, shape index: {}]   ;;  %s3519_s1 = inlined_call_operand.vmem [shape: bf16[12,32], index: 1, kind: input, shape index: {}]   ;;  %s3520_s2 = inlined_call_operand.vmem [shape: f32[1,32], index: 2, kind: input, shape index: {}]   ;;  %s3521_s3 = inlined_call_operand.vmem [shape: f32[512,32], index: 3, kind: output, shape index: {}]  }
   0x1   :  { %v1953_v0 = vld [vmem:[%s3518_s0 + $0x100] sm:$0xff]  ;;  %v1963_v2 = vld [vmem:[%s3518_s0 + $0x108] sm:$0xff]  ;;  %v1981_v8 = vld [vmem:[%s3518_s0 + $0x18] sm:$0xff] }
   0x2   :  { %v1958_v1 = vld [vmem:[%s3518_s0] sm:$0xff]  ;;  %v111_v3 = vmul.f32 %v1953_v0, %v1953_v0  ;;  %v112_v5 = vmul.f32 %v1963_v2, %v1963_v2  ;;  %v1974_v6 = vld [vmem:[%s3518_s0 + $0x8] sm:$0xff]  ;;  %v1986_v9 = vld [vmem:[%s3518_s0 + $0x10] sm:$0xff]  ;;  %v82_v14 = vmul.f32 %v1981_v8, %v1981_v8 }
   0x3   :  { %v79_v4 = vmul.f32 %v1958_v1, %v1958_v1  ;;  %v80_v7 = vmul.f32 %v1974_v6, %v1974_v6  ;;  %v81_v15 = vmul.f32 %v1986_v9, %v1986_v9  ;;  %v1999_v16 = vld [vmem:[%s3518_s0 + $0x118] sm:$0xff]  ;;  %v2004_v17 = vld [vmem:[%s3518_s0 + $0x110] sm:$0xff]  ;;  %v20_v22 = vld [vmem:[%s3518_s0 + $0x28] sm:$0xff] }
   0x4   :  { %v240_v10 = vsel %vm143_vm0, %v111_v3, 0.0  ;;  %v243_v12 = vsel %vm143_vm0, %v112_v5, 0.0  ;;  %v153_v18 = vsel %vm143_vm0, %v82_v14, 0.0  ;;  %v114_v20 = vmul.f32 %v1999_v16, %v1999_v16  ;;  %v19_v23 = vld [vmem:[%s3518_s0 + $0x20] sm:$0xff]  ;;  %v52_v28 = vld [vmem:[%s3518_s0 + $0x128] sm:$0xff]  ;;  %v22_v34 = vld [vmem:[%s3518_s0 + $0x38] sm:$0xff] }
   0x5   :  { %v144_v11 = vsel %vm143_vm0, %v79_v4, 0.0  ;;  %241 = vadd.xlane.f32.xlu1 %v240_v10  ;;  %v147_v13 = vsel %vm143_vm0, %v80_v7, 0.0  ;;  %v150_v19 = vsel %vm143_vm0, %v81_v15, 0.0  ;;  %v113_v21 = vmul.f32 %v2004_v17, %v2004_v17  ;;  %v51_v29 = vld [vmem:[%s3518_s0 + $0x120] sm:$0xff]  ;;  %v21_v35 = vld [vmem:[%s3518_s0 + $0x30] sm:$0xff]  ;;  %v54_v40 = vld [vmem:[%s3518_s0 + $0x138] sm:$0xff] }
   0x6   :  { %145 = vadd.xlane.f32.xlu0 %v144_v11  ;;  %v249_v24 = vsel %vm143_vm0, %v114_v20, 0.0  ;;  %v84_v26 = vmul.f32 %v20_v22, %v20_v22  ;;  %v83_v27 = vmul.f32 %v19_v23, %v19_v23  ;;  %v116_v32 = vmul.f32 %v52_v28, %v52_v28  ;;  %v53_v41 = vld [vmem:[%s3518_s0 + $0x130] sm:$0xff]  ;;  %v24_v46 = vld [vmem:[%s3518_s0 + $0x48] sm:$0xff]  ;;  %v23_v47 = vld [vmem:[%s3518_s0 + $0x40] sm:$0xff] }
   0x7   :  { %v246_v25 = vsel %vm143_vm0, %v113_v21, 0.0  ;;  %v115_v33 = vmul.f32 %v51_v29, %v51_v29  ;;  %v86_v38 = vmul.f32 %v22_v34, %v22_v34  ;;  %v85_v39 = vmul.f32 %v21_v35, %v21_v35  ;;  %v56_v52 = vld [vmem:[%s3518_s0 + $0x148] sm:$0xff]  ;;  %v55_v53 = vld [vmem:[%s3518_s0 + $0x140] sm:$0xff]  ;;  %v26_v58 = vld [vmem:[%s3518_s0 + $0x58] sm:$0xff] }
   0x8   :  { %v159_v30 = vsel %vm143_vm0, %v84_v26, 0.0  ;;  %v156_v31 = vsel %vm143_vm0, %v83_v27, 0.0  ;;  %v255_v36 = vsel %vm143_vm0, %v116_v32, 0.0  ;;  %v118_v44 = vmul.f32 %v54_v40, %v54_v40  ;;  %v25_v59 = vld [vmem:[%s3518_s0 + $0x50] sm:$0xff]  ;;  %v58_v3 = vld [vmem:[%s3518_s0 + $0x158] sm:$0xff]  ;;  %v60_v20 = vld [vmem:[%s3518_s0 + $0x168] sm:$0xff] }
   0x9   :  { %244 = vadd.xlane.f32.xlu1 %v243_v12  ;;  %v252_v37 = vsel %vm143_vm0, %v115_v33, 0.0  ;;  %v165_v42 = vsel %vm143_vm0, %v86_v38, 0.0  ;;  %v162_v43 = vsel %vm143_vm0, %v85_v39, 0.0  ;;  %v117_v45 = vmul.f32 %v53_v41, %v53_v41  ;;  %v57_v4 = vld [vmem:[%s3518_s0 + $0x150] sm:$0xff]  ;;  %v28_v12 = vld [vmem:[%s3518_s0 + $0x68] sm:$0xff]  ;;  %v59_v21 = vld [vmem:[%s3518_s0 + $0x160] sm:$0xff] }
   0xa   :  { %148 = vadd.xlane.f32.xlu0 %v147_v13  ;;  %v261_v48 = vsel %vm143_vm0, %v118_v44, 0.0  ;;  %v88_v50 = vmul.f32 %v24_v46, %v24_v46  ;;  %v87_v51 = vmul.f32 %v23_v47, %v23_v47  ;;  %v120_v56 = vmul.f32 %v56_v52, %v56_v52  ;;  %v27_v13 = vld [vmem:[%s3518_s0 + $0x60] sm:$0xff]  ;;  %v30_v26 = vld [vmem:[%s3518_s0 + $0x78] sm:$0xff]  ;;  %v29_v27 = vld [vmem:[%s3518_s0 + $0x70] sm:$0xff] }
   0xb   :  { %v258_v49 = vsel %vm143_vm0, %v117_v45, 0.0  ;;  %v119_v57 = vmul.f32 %v55_v53, %v55_v53  ;;  %v90_v62 = vmul.f32 %v26_v58, %v26_v58  ;;  %v89_v63 = vmul.f32 %v25_v59, %v25_v59  ;;  %v62_v32 = vld [vmem:[%s3518_s0 + $0x178] sm:$0xff]  ;;  %v61_v33 = vld [vmem:[%s3518_s0 + $0x170] sm:$0xff]  ;;  %v32_v38 = vld [vmem:[%s3518_s0 + $0x88] sm:$0xff] }
   0xc   :  { %v171_v54 = vsel %vm143_vm0, %v88_v50, 0.0  ;;  %v168_v55 = vsel %vm143_vm0, %v87_v51, 0.0  ;;  %v267_v60 = vsel %vm143_vm0, %v120_v56, 0.0  ;;  %v122_v10 = vmul.f32 %v58_v3, %v58_v3  ;;  %v31_v39 = vld [vmem:[%s3518_s0 + $0x80] sm:$0xff]  ;;  %v64_v45 = vld [vmem:[%s3518_s0 + $0x188] sm:$0xff]  ;;  %v34_v51 = vld [vmem:[%s3518_s0 + $0x98] sm:$0xff] }
   0xd   :  { %154 = vadd.xlane.f32.xlu1 %v153_v18  ;;  %v264_v61 = vsel %vm143_vm0, %v119_v57, 0.0  ;;  %v177_v5 = vsel %vm143_vm0, %v90_v62, 0.0  ;;  %v174_v7 = vsel %vm143_vm0, %v89_v63, 0.0  ;;  %v121_v11 = vmul.f32 %v57_v4, %v57_v4  ;;  %v1617_v44 = vld [vmem:[%s3519_s1] sm:$0x3f]   ;;  %v33_v52 = vld [vmem:[%s3518_s0 + $0x90] sm:$0xff] }
   0xe   :  { %151 = vadd.xlane.f32.xlu0 %v150_v19  ;;  %v273_v14 = vsel %vm143_vm0, %v122_v10, 0.0  ;;  %v92_v18 = vmul.f32 %v28_v12, %v28_v12  ;;  %v91_v19 = vmul.f32 %v27_v13, %v27_v13  ;;  %v126_v34 = vmul.f32 %v62_v32, %v62_v32  ;;  %v63_v46 = vld [vmem:[%s3518_s0 + $0x180] sm:$0xff]  ;;  %1615 = vmatprep.subr.msk.bf16.mxu0 %vm1118_vm1, %v1617_v44  ;;  %v66_v58 = vld [vmem:[%s3518_s0 + $0x198] sm:$0xff]  ;;  %v65_v59 = vld [vmem:[%s3518_s0 + $0x190] sm:$0xff] }
   0xf   :  { %v270_v15 = vsel %vm143_vm0, %v121_v11, 0.0  ;;  %v125_v35 = vmul.f32 %v61_v33, %v61_v33  ;;  %1616 = vmatprep.subr.msk.bf16.mxu1 %vm1118_vm1, %v1617_v44  ;;  %v127_v50 = vmul.f32 %v63_v46, %v63_v46  ;;  %v98_v53 = vmul.f32 %v34_v51, %v34_v51  ;;  %v36_v3 = vld [vmem:[%s3518_s0 + $0xa8] sm:$0xff]  ;;  %v35_v4 = vld [vmem:[%s3518_s0 + $0xa0] sm:$0xff]  ;;  %v73_v51 = vld [vmem:[%s3518_s0 + $0x1d0] sm:$0xff] }
  0x10   :  { %v183_v22 = vsel %vm143_vm0, %v92_v18, 0.0  ;;  %v180_v23 = vsel %vm143_vm0, %v91_v19, 0.0  ;;  %v285_v40 = vsel %vm143_vm0, %v126_v34, 0.0  ;;  %v97_v56 = vmul.f32 %v33_v52, %v33_v52  ;;  %v68_v12 = vld [vmem:[%s3518_s0 + $0x1a8] sm:$0xff]  ;;  %v67_v13 = vld [vmem:[%s3518_s0 + $0x1a0] sm:$0xff] }
  0x11   :  { %250 = vadd.xlane.f32.xlu1 %v249_v24  ;;  %v124_v24 = vmul.f32 %v60_v20, %v60_v20  ;;  %v282_v41 = vsel %vm143_vm0, %v125_v35, 0.0  ;;  %v1120_v57 = vsel %vm1118_vm1, %v1617_v44, 0  ;;  %v130_v62 = vmul.f32 %v66_v58, %v66_v58  ;;  %v38_v20 = vld [vmem:[%s3518_s0 + $0xb8] sm:$0xff]  ;;  %v40_v32 = vld [vmem:[%s3518_s0 + $0xc8] sm:$0xff]  ;;  %v39_v33 = vld [vmem:[%s3518_s0 + $0xc0] sm:$0xff] }
  0x12   :  { %247 = vadd.xlane.f32.xlu0 %v246_v25  ;;  %v123_v25 = vmul.f32 %v59_v21, %v59_v21  ;;  %1548 = vmatpush3.bf16.msra.mxu0 %v1120_v57  ;;  %v129_v63 = vmul.f32 %v65_v59, %v65_v59  ;;  %v100_v10 = vmul.f32 %v36_v3, %v36_v3  ;;  %v37_v21 = vld [vmem:[%s3518_s0 + $0xb0] sm:$0xff]  ;;  %v42_v44 = vld [vmem:[%s3518_s0 + $0xd8] sm:$0xff] }
  0x13   :  { %v279_v28 = vsel %vm143_vm0, %v124_v24, 0.0  ;;  %1614 = vmatpush3.bf16.msra.mxu1 %v1120_v57  ;;  %v99_v11 = vmul.f32 %v35_v4, %v35_v4  ;;  %v132_v18 = vmul.f32 %v68_v12, %v68_v12  ;;  %v131_v19 = vmul.f32 %v67_v13, %v67_v13  ;;  %v43_v57 = vld [vmem:[%s3518_s0 + $0xe0] sm:$0xff] }
  0x14   :  { %v276_v29 = vsel %vm143_vm0, %v123_v25, 0.0  ;;  %v102_v24 = vmul.f32 %v38_v20, %v38_v20  ;;  %v101_v25 = vmul.f32 %v37_v21, %v37_v21 }
  0x15   :  { %160 = vadd.xlane.f32.xlu1 %v159_v30  ;;  %v94_v30 = vmul.f32 %v30_v26, %v30_v26  ;;  %v70_v26 = vld [vmem:[%s3518_s0 + $0x1b8] sm:$0xff] }
  0x16   :  { %157 = vadd.xlane.f32.xlu0 %v156_v31  ;;  %v93_v31 = vmul.f32 %v29_v27, %v29_v27  ;;  %v69_v27 = vld [vmem:[%s3518_s0 + $0x1b0] sm:$0xff] }
  0x19   :  { %256 = vadd.xlane.f32.xlu1 %v255_v36  ;;  %v189_v36 = vsel %vm143_vm0, %v94_v30, 0.0  ;;  %v134_v30 = vmul.f32 %v70_v26, %v70_v26 }
  0x1a   :  { %253 = vadd.xlane.f32.xlu0 %v252_v37  ;;  %v186_v37 = vsel %vm143_vm0, %v93_v31, 0.0  ;;  %v133_v31 = vmul.f32 %v69_v27, %v69_v27 }
  0x1b   :  { %v309_v34 = vsel %vm143_vm0, %v134_v30, 0.0 }
  0x1c   :  { %v306_v35 = vsel %vm143_vm0, %v133_v31, 0.0 }
  0x1d   :  { %166 = vadd.xlane.f32.xlu1 %v165_v42  ;;  %v96_v42 = vmul.f32 %v32_v38, %v32_v38  ;;  %v72_v38 = vld [vmem:[%s3518_s0 + $0x1c8] sm:$0xff] }
  0x1e   :  { %163 = vadd.xlane.f32.xlu0 %v162_v43  ;;  %v95_v43 = vmul.f32 %v31_v39, %v31_v39  ;;  %v71_v39 = vld [vmem:[%s3518_s0 + $0x1c0] sm:$0xff] }
  0x1f   :  { %v195_v47 = vsel %vm143_vm0, %v96_v42, 0.0  ;;  %v136_v42 = vmul.f32 %v72_v38, %v72_v38 }
  0x21   :  { %262 = vadd.xlane.f32.xlu1 %v261_v48  ;;  %v192_v48 = vsel %vm143_vm0, %v95_v43, 0.0  ;;  %v135_v43 = vmul.f32 %v71_v39, %v71_v39  ;;  %v315_v46 = vsel %vm143_vm0, %v136_v42, 0.0 }
  0x22   :  { %259 = vadd.xlane.f32.xlu0 %v258_v49  ;;  %v128_v49 = vmul.f32 %v64_v45, %v64_v45  ;;  %v41_v45 = vld [vmem:[%s3518_s0 + $0xd0] sm:$0xff] }
  0x25   :  { %172 = vadd.xlane.f32.xlu1 %v171_v54  ;;  %v291_v54 = vsel %vm143_vm0, %v128_v49, 0.0  ;;  %v105_v49 = vmul.f32 %v41_v45, %v41_v45 }
  0x26   :  { %169 = vadd.xlane.f32.xlu0 %v168_v55  ;;  %v288_v55 = vsel %vm143_vm0, %v127_v50, 0.0  ;;  %v74_v50 = vld [vmem:[%s3518_s0 + $0x1d8] sm:$0xff] }
  0x29   :  { %268 = vadd.xlane.f32.xlu1 %v267_v60  ;;  %v201_v60 = vsel %vm143_vm0, %v98_v53, 0.0  ;;  %v222_v53 = vsel %vm143_vm0, %v105_v49, 0.0 }
  0x2a   :  { %265 = vadd.xlane.f32.xlu0 %v264_v61  ;;  %v198_v61 = vsel %vm143_vm0, %v97_v56, 0.0  ;;  %v44_v56 = vld [vmem:[%s3518_s0 + $0xe8] sm:$0xff] }
  0x2d   :  { %178 = vadd.xlane.f32.xlu1 %v177_v5  ;;  %v297_v5 = vsel %vm143_vm0, %v130_v62, 0.0  ;;  %v76_v62 = vld [vmem:[%s3518_s0 + $0x1e8] sm:$0xff] }
  0x2e   :  { %175 = vadd.xlane.f32.xlu0 %v174_v7  ;;  %v294_v7 = vsel %vm143_vm0, %v129_v63, 0.0  ;;  %v75_v63 = vld [vmem:[%s3518_s0 + $0x1e0] sm:$0xff] }
  0x31   :  { %274 = vadd.xlane.f32.xlu1 %v273_v14  ;;  %v207_v14 = vsel %vm143_vm0, %v100_v10, 0.0  ;;  %v46_v10 = vld [vmem:[%s3518_s0 + $0xf8] sm:$0xff] }
  0x32   :  { %271 = vadd.xlane.f32.xlu0 %v270_v15  ;;  %v204_v15 = vsel %vm143_vm0, %v99_v11, 0.0  ;;  %v45_v11 = vld [vmem:[%s3518_s0 + $0xf0] sm:$0xff] }
  0x35   :  { %184 = vadd.xlane.f32.xlu1 %v183_v22  ;;  %v303_v22 = vsel %vm143_vm0, %v132_v18, 0.0  ;;  %v78_v18 = vld [vmem:[%s3518_s0 + $0x1f8] sm:$0xff] }
  0x36   :  { %181 = vadd.xlane.f32.xlu0 %v180_v23  ;;  %v300_v23 = vsel %vm143_vm0, %v131_v19, 0.0  ;;  %v77_v19 = vld [vmem:[%s3518_s0 + $0x1f0] sm:$0xff] }
  0x39   :  { %280 = vadd.xlane.f32.xlu1 %v279_v28  ;;  %v213_v28 = vsel %vm143_vm0, %v102_v24, 0.0 }
  0x3a   :  { %277 = vadd.xlane.f32.xlu0 %v276_v29  ;;  %v210_v29 = vsel %vm143_vm0, %v101_v25, 0.0 }
  0x3d   :  { %190 = vadd.xlane.f32.xlu1 %v189_v36  ;;  %v104_v36 = vmul.f32 %v40_v32, %v40_v32 }
  0x3e   :  { %187 = vadd.xlane.f32.xlu0 %v186_v37  ;;  %v103_v37 = vmul.f32 %v39_v33, %v39_v33 }
  0x41   :  { %286 = vadd.xlane.f32.xlu1 %v285_v40  ;;  %v219_v40 = vsel %vm143_vm0, %v104_v36, 0.0 }
  0x42   :  { %283 = vadd.xlane.f32.xlu0 %v282_v41  ;;  %v216_v41 = vsel %vm143_vm0, %v103_v37, 0.0 }
  0x45   :  { %196 = vadd.xlane.f32.xlu1 %v195_v47  ;;  %v312_v47 = vsel %vm143_vm0, %v135_v43, 0.0 }
  0x46   :  { %193 = vadd.xlane.f32.xlu0 %v192_v48  ;;  %v106_v48 = vmul.f32 %v42_v44, %v42_v44 }
  0x48   :  { %v225_v52 = vsel %vm143_vm0, %v106_v48, 0.0 }
  0x49   :  { %292 = vadd.xlane.f32.xlu1 %v291_v54  ;;  %v138_v54 = vmul.f32 %v74_v50, %v74_v50 }
  0x4a   :  { %289 = vadd.xlane.f32.xlu0 %v288_v55  ;;  %v137_v55 = vmul.f32 %v73_v51, %v73_v51 }
  0x4b   :  { %v321_v58 = vsel %vm143_vm0, %v138_v54, 0.0 }
  0x4c   :  { %v318_v59 = vsel %vm143_vm0, %v137_v55, 0.0 }
  0x4d   :  { %202 = vadd.xlane.f32.xlu1 %v201_v60  ;;  %v108_v60 = vmul.f32 %v44_v56, %v44_v56 }
  0x4e   :  { %199 = vadd.xlane.f32.xlu0 %v198_v61  ;;  %v107_v61 = vmul.f32 %v43_v57, %v43_v57 }
  0x4f   :  { %v231_v3 = vsel %vm143_vm0, %v108_v60, 0.0 }
  0x50   :  { %v228_v4 = vsel %vm143_vm0, %v107_v61, 0.0 }
  0x51   :  { %298 = vadd.xlane.f32.xlu1 %v297_v5  ;;  %v140_v5 = vmul.f32 %v76_v62, %v76_v62 }
  0x52   :  { %295 = vadd.xlane.f32.xlu0 %v294_v7  ;;  %v139_v7 = vmul.f32 %v75_v63, %v75_v63 }
  0x53   :  { %v327_v12 = vsel %vm143_vm0, %v140_v5, 0.0 }
  0x54   :  { %v324_v13 = vsel %vm143_vm0, %v139_v7, 0.0 }
  0x55   :  { %208 = vadd.xlane.f32.xlu1 %v207_v14  ;;  %v110_v14 = vmul.f32 %v46_v10, %v46_v10 }
  0x56   :  { %205 = vadd.xlane.f32.xlu0 %v204_v15  ;;  %v109_v15 = vmul.f32 %v45_v11, %v45_v11 }
  0x57   :  { %v237_v20 = vsel %vm143_vm0, %v110_v14, 0.0 }
  0x58   :  { %v234_v21 = vsel %vm143_vm0, %v109_v15, 0.0 }
  0x59   :  { %304 = vadd.xlane.f32.xlu1 %v303_v22  ;;  %v142_v22 = vmul.f32 %v78_v18, %v78_v18 }
  0x5a   :  { %301 = vadd.xlane.f32.xlu0 %v300_v23  ;;  %v141_v23 = vmul.f32 %v77_v19, %v77_v19 }
  0x5b   :  { %v333_v24 = vsel %vm143_vm0, %v142_v22, 0.0 }
  0x5c   :  { %v330_v25 = vsel %vm143_vm0, %v141_v23, 0.0 }
  0x5d   :  { %214 = vadd.xlane.f32.xlu1 %v213_v28 }
  0x5e   :  { %211 = vadd.xlane.f32.xlu0 %v210_v29 }
  0x61   :  { %310 = vadd.xlane.f32.xlu1 %v309_v34 }
  0x62   :  { %307 = vadd.xlane.f32.xlu0 %v306_v35 }
  0x65   :  { %220 = vadd.xlane.f32.xlu1 %v219_v40 }
  0x66   :  { %217 = vadd.xlane.f32.xlu0 %v216_v41 }
  0x69   :  { %316 = vadd.xlane.f32.xlu1 %v315_v46 }
  0x6a   :  { %313 = vadd.xlane.f32.xlu0 %v312_v47 }
  0x6d   :  { %226 = vadd.xlane.f32.xlu1 %v225_v52 }
  0x6e   :  { %223 = vadd.xlane.f32.xlu0 %v222_v53 }
  0x71   :  { %322 = vadd.xlane.f32.xlu1 %v321_v58 }
  0x72   :  { %319 = vadd.xlane.f32.xlu0 %v318_v59 }
  0x75   :  { %232 = vadd.xlane.f32.xlu1 %v231_v3 }
  0x76   :  { %229 = vadd.xlane.f32.xlu0 %v228_v4 }
  0x79   :  { %328 = vadd.xlane.f32.xlu1 %v327_v12 }
  0x7a   :  { %325 = vadd.xlane.f32.xlu0 %v324_v13 }
  0x7d   :  { %238 = vadd.xlane.f32.xlu1 %v237_v20 }
  0x7e   :  { %235 = vadd.xlane.f32.xlu0 %v234_v21 }
  0x81   :  { %334 = vadd.xlane.f32.xlu1 %v333_v24 }
  0x82   :  { %331 = vadd.xlane.f32.xlu0 %v330_v25 }
  0x8e   :  { %v242_v26 = vpop.xlane.xlu1 %241 }
  0x8f   :  { %v146_v27 = vpop.xlane.xlu0 %145  ;;  %1618 = vrsqrt.f32 %v242_v26  ;;  %vm562_vm2 = vcmp.eq.f32.partialorder %v242_v26, inf  ;;  %v565_v37 = vand.u32 2147483648, %v242_v26  ;;  %vm564_vm3 = vcmp.eq.f32.partialorder %v242_v26, 0.0 }
  0x90   :  { %1620 = vrsqrt.f32 %v146_v27  ;;  %vm338_vm4 = vcmp.eq.f32.partialorder %v146_v27, inf  ;;  %vm340_vm5 = vcmp.eq.f32.partialorder %v146_v27, 0.0  ;;  %v341_v46 = vand.u32 2147483648, %v146_v27 }
  0x92   :  { %v245_v28 = vpop.xlane.xlu1 %244 }
  0x93   :  { %v149_v29 = vpop.xlane.xlu0 %148  ;;  %1622 = vrsqrt.f32 %v245_v28  ;;  %vm569_vm6 = vcmp.eq.f32.partialorder %v245_v28, inf  ;;  %vm571_vm7 = vcmp.eq.f32.partialorder %v245_v28, 0.0  ;;  %v572_v48 = vand.u32 2147483648, %v245_v28 }
  0x94   :  { %1624 = vrsqrt.f32 %v149_v29  ;;  %vm345_vm8 = vcmp.eq.f32.partialorder %v149_v29, inf  ;;  %v348_v55 = vand.u32 2147483648, %v149_v29  ;;  %vm347_vm9 = vcmp.eq.f32.partialorder %v149_v29, 0.0 }
  0x96   :  { %v2244_v30 = vpop.xlane.xlu1 %154 }
  0x97   :  { %v2246_v31 = vpop.xlane.xlu0 %151  ;;  %vm359_vm11 = vcmp.eq.f32.partialorder %v2244_v30, inf  ;;  %vm361_vm12 = vcmp.eq.f32.partialorder %v2244_v30, 0.0  ;;  %v362_v15 = vand.u32 2147483648, %v2244_v30 }
  0x98   :  { %1626 = vrsqrt.f32 %v2246_v31  ;;  %vm352_vm10 = vcmp.eq.f32.partialorder %v2246_v31, inf  ;;  %v355_v18 = vand.u32 2147483648, %v2246_v31  ;;  %vm354_vm13 = vcmp.eq.f32.partialorder %v2246_v31, 0.0 }
  0x99   :  { %1628 = vrsqrt.f32 %v2244_v30 }
  0x9a   :  { %v2250_v32 = vpop.xlane.xlu1 %250 }
  0x9b   :  { %v2252_v33 = vpop.xlane.xlu0 %247  ;;  %1630 = vrsqrt.f32 %v2250_v32  ;;  %vm583_vm14 = vcmp.eq.f32.partialorder %v2250_v32, inf  ;;  %vm585_vm15 = vcmp.eq.f32.partialorder %v2250_v32, 0.0  ;;  %v586_v25 = vand.u32 2147483648, %v2250_v32 }
  0x9c   :  { %v1619_v34 = vpop.eup %1618  ;;  %1632 = vrsqrt.f32 %v2252_v33  ;;  %vm576_vm1 = vcmp.eq.f32.partialorder %v2252_v33, inf }
  0x9d   :  { %v1621_v35 = vpop.eup %1620  ;;  %v561_v36 = vmul.f32 %v1619_v34, %v242_v26 }
  0x9e   :  { %v337_v38 = vmul.f32 %v1621_v35, %v146_v27  ;;  %v2256_v39 = vpop.xlane.xlu1 %160 }
  0x9f   :  { %v2258_v40 = vpop.xlane.xlu0 %157  ;;  %v563_v41 = vsel %vm562_vm2, %v242_v26, %v561_v36  ;;  %1634 = vrsqrt.f32 %v2256_v39  ;;  %vm578_vm2 = vcmp.eq.f32.partialorder %v2252_v33, 0.0 }
  0xa0   :  { %v1623_v42 = vpop.eup %1622  ;;  %v566_v43 = vsel %vm564_vm3, %v565_v37, %v563_v41  ;;  %v339_v44 = vsel %vm338_vm4, %v146_v27, %v337_v38  ;;  %1636 = vrsqrt.f32 %v2258_v40  ;;  %vm373_vm3 = vcmp.eq.f32.partialorder %v2256_v39, inf }
  0xa1   :  { %v1625_v45 = vpop.eup %1624  ;;  %v568_v47 = vmul.f32 %v1623_v42, %v245_v28  ;;  %v816_v52 = vmax.f32 %v566_v43, 1e-12  ;;  %v342_v53 = vsel %vm340_vm5, %v341_v46, %v339_v44  ;;  %vm375_vm4 = vcmp.eq.f32.partialorder %v2256_v39, 0.0 }
  0xa2   :  { %v344_v49 = vmul.f32 %v1625_v45, %v149_v29  ;;  %v2262_v50 = vpop.xlane.xlu1 %256  ;;  %v784_v61 = vmax.f32 %v342_v53, 1e-12  ;;  %v376_v37 = vand.u32 2147483648, %v2256_v39  ;;  %vm366_vm5 = vcmp.eq.f32.partialorder %v2258_v40, inf }
  0xa3   :  { %v2264_v51 = vpop.xlane.xlu0 %253  ;;  %v570_v54 = vsel %vm569_vm6, %v245_v28, %v568_v47  ;;  %1638 = vrsqrt.f32 %v2262_v50  ;;  %vm368_vm6 = vcmp.eq.f32.partialorder %v2258_v40, 0.0 }
  0xa4   :  { %v573_v56 = vsel %vm571_vm7, %v572_v48, %v570_v54  ;;  %v346_v57 = vsel %vm345_vm8, %v149_v29, %v344_v49  ;;  %1640 = vrcp.f32 %v816_v52  ;;  %v579_v29 = vand.u32 2147483648, %v2252_v33 }
  0xa5   :  { %v1627_v58 = vpop.eup %1626  ;;  %v349_v59 = vsel %vm347_vm9, %v348_v55, %v346_v57  ;;  %v817_v4 = vmax.f32 %v573_v56, 1e-12  ;;  %1642 = vrsqrt.f32 %v2264_v51  ;;  %vm597_vm7 = vcmp.eq.f32.partialorder %v2262_v50, inf }
  0xa6   :  { %v1629_v60 = vpop.eup %1628  ;;  %v351_v62 = vmul.f32 %v1627_v58, %v2246_v31  ;;  %v2268_v63 = vpop.xlane.xlu1 %166  ;;  %v785_v7 = vmax.f32 %v349_v59, 1e-12  ;;  %vm599_vm8 = vcmp.eq.f32.partialorder %v2262_v50, 0.0  ;;  %v600_v48 = vand.u32 2147483648, %v2262_v50 }
  0xa7   :  { %v2270_v3 = vpop.xlane.xlu0 %163  ;;  %v358_v11 = vmul.f32 %v1629_v60, %v2244_v30  ;;  %1644 = vrsqrt.f32 %v2268_v63  ;;  %vm590_vm9 = vcmp.eq.f32.partialorder %v2264_v51, inf  ;;  %v593_v56 = vand.u32 2147483648, %v2264_v51 }
  0xa8   :  { %v1631_v5 = vpop.eup %1630  ;;  %1646 = vrcp.f32 %v784_v61  ;;  %v353_v12 = vsel %vm352_vm10, %v2246_v31, %v351_v62  ;;  %vm592_vm10 = vcmp.eq.f32.partialorder %v2264_v51, 0.0  ;;  %v390_v61 = vand.u32 2147483648, %v2268_v63 }
  0xa9   :  { %v1633_v10 = vpop.eup %1632  ;;  %1648 = vrcp.f32 %v817_v4  ;;  %v582_v19 = vmul.f32 %v1631_v5, %v2250_v32  ;;  %v360_v22 = vsel %vm359_vm11, %v2244_v30, %v358_v11  ;;  %v356_v23 = vsel %vm354_vm13, %v355_v18, %v353_v12 }
  0xaa   :  { %v2279_v13 = vpop.xlane.xlu1 %262  ;;  %1650 = vrcp.f32 %v785_v7  ;;  %v575_v20 = vmul.f32 %v1633_v10, %v2252_v33  ;;  %v363_v31 = vsel %vm361_vm12, %v362_v15, %v360_v22  ;;  %v786_v34 = vmax.f32 %v356_v23, 1e-12 }
  0xab   :  { %v2281_v14 = vpop.xlane.xlu0 %259  ;;  %1652 = vrsqrt.f32 %v2270_v3  ;;  %v584_v28 = vsel %vm583_vm14, %v2250_v32, %v582_v19  ;;  %v369_v30 = vand.u32 2147483648, %v2258_v40  ;;  %v787_v45 = vmax.f32 %v363_v31, 1e-12 }
  0xac   :  { %v1635_v21 = vpop.eup %1634  ;;  %1654 = vrsqrt.f32 %v2279_v13  ;;  %v577_v35 = vsel %vm576_vm1, %v2252_v33, %v575_v20  ;;  %v587_v42 = vsel %vm585_vm15, %v586_v25, %v584_v28  ;;  %vm387_vm11 = vcmp.eq.f32.partialorder %v2268_v63, inf }
  0xad   :  { %v1637_v24 = vpop.eup %1636  ;;  %v372_v36 = vmul.f32 %v1635_v21, %v2256_v39  ;;  %1656 = vrsqrt.f32 %v2281_v14  ;;  %v580_v46 = vsel %vm578_vm2, %v579_v29, %v577_v35  ;;  %v819_v52 = vmax.f32 %v587_v42, 1e-12 }
  0xae   :  { %v2296_v26 = vpop.xlane.xlu1 %172  ;;  %v365_v38 = vmul.f32 %v1637_v24, %v2258_v40  ;;  %v818_v55 = vmax.f32 %v580_v46, 1e-12  ;;  %vm389_vm12 = vcmp.eq.f32.partialorder %v2268_v63, 0.0  ;;  %vm380_vm13 = vcmp.eq.f32.partialorder %v2270_v3, inf }
  0xaf   :  { %v2298_v27 = vpop.xlane.xlu0 %169  ;;  %1658 = vrsqrt.f32 %v2296_v26  ;;  %v374_v47 = vsel %vm373_vm3, %v2256_v39, %v372_v36  ;;  %vm382_vm14 = vcmp.eq.f32.partialorder %v2270_v3, 0.0  ;;  %v383_v7 = vand.u32 2147483648, %v2270_v3 }
  0xb0   :  { %v1639_v41 = vpop.eup %1638  ;;  %1660 = vrcp.f32 %v786_v34  ;;  %v367_v33 = vsel %vm366_vm5, %v2258_v40, %v365_v38  ;;  %v377_v60 = vsel %vm375_vm4, %v376_v37, %v374_v47  ;;  %vm611_vm15 = vcmp.eq.f32.partialorder %v2279_v13, inf }
  0xb1   :  { %v1641_v32 = vpop.eup %1640  ;;  %v596_v53 = vmul.f32 %v1639_v41, %v2262_v50  ;;  %1662 = vrsqrt.f32 %v2298_v27  ;;  %v370_v4 = vsel %vm368_vm6, %v369_v30, %v367_v33  ;;  %v789_v40 = vmax.f32 %v377_v60, 1e-12 }
  0xb2   :  { %v2317_v43 = vpop.xlane.xlu1 %268  ;;  %v1643_v49 = vpop.eup %1642  ;;  %vm613_vm1 = vcmp.eq.f32.partialorder %v2279_v13, 0.0  ;;  %v614_v15 = vand.u32 2147483648, %v2279_v13  ;;  %vm604_vm2 = vcmp.eq.f32.partialorder %v2281_v14, inf  ;;  %v788_v21 = vmax.f32 %v370_v4, 1e-12 }
  0xb3   :  { %v2319_v44 = vpop.xlane.xlu0 %265  ;;  %1664 = vrsqrt.f32 %v2317_v43  ;;  %v589_v5 = vmul.f32 %v1643_v49, %v2264_v51  ;;  %v598_v39 = vsel %vm597_vm7, %v2262_v50, %v596_v53  ;;  %v607_v23 = vand.u32 2147483648, %v2281_v14 }
  0xb4   :  { %v1645_v54 = vpop.eup %1644  ;;  %1666 = vrcp.f32 %v787_v45  ;;  %v601_v24 = vsel %vm599_vm8, %v600_v48, %v598_v39  ;;  %vm606_vm3 = vcmp.eq.f32.partialorder %v2281_v14, 0.0  ;;  %vm401_vm4 = vcmp.eq.f32.partialorder %v2296_v26, inf }
  0xb5   :  { %v1647_v59 = vpop.eup %1646  ;;  %1668 = vrcp.f32 %v819_v52  ;;  %v386_v11 = vmul.f32 %v1645_v54, %v2268_v63  ;;  %v591_v25 = vsel %vm590_vm9, %v2264_v51, %v589_v5  ;;  %v913_v36 = vmul.f32 %v1641_v32, %v1953_v0 }
  0xb6   :  { %v2339_v57 = vpop.xlane.xlu1 %178  ;;  %v1649_v62 = vpop.eup %1648  ;;  %1670 = vrcp.f32 %v818_v55  ;;  %v849_v50 = vmul.f32 %v1647_v59, %v1958_v1  ;;  %v821_v30 = vmax.f32 %v601_v24, 1e-12  ;;  %v594_v1 = vsel %vm592_vm10, %v593_v56, %v591_v25 }
  0xb7   :  { %v2341_v58 = vpop.xlane.xlu0 %175  ;;  %v1651_v10 = vpop.eup %1650  ;;  %1672 = vrsqrt.f32 %v2319_v44  ;;  %v388_v29 = vsel %vm387_vm11, %v2268_v63, %v386_v11  ;;  %v915_v37 = vmul.f32 %v1649_v62, %v1963_v2  ;;  %vm403_vm5 = vcmp.eq.f32.partialorder %v2296_v26, 0.0 }
  0xb8   :  { %v1653_v12 = vpop.eup %1652  ;;  %1674 = vrsqrt.f32 %v2339_v57  ;;  %v851_v31 = vmul.f32 %v1651_v10, %v1974_v6  ;;  %v391_v46 = vsel %vm389_vm12, %v390_v61, %v388_v29  ;;  %v404_v48 = vand.u32 2147483648, %v2296_v26 }
  0xb9   :  { %v1655_v20 = vpop.eup %1654  ;;  %v379_v22 = vmul.f32 %v1653_v12, %v2270_v3  ;;  %1676 = vrsqrt.f32 %v2341_v58  ;;  %v992_v2 = vpack.c.bf16 %v915_v37, %v913_v36  ;;  %v820_v49 = vmax.f32 %v594_v1, 1e-12 }
  0xba   :  { %v2361_v18 = vpop.xlane.xlu1 %274  ;;  %v610_v28 = vmul.f32 %v1655_v20, %v2279_v13  ;;  %v1657_v34 = vpop.eup %1656  ;;  %1678 = vrcp.f32 %v789_v40  ;;  %v976_v45 = vpack.c.bf16 %v851_v31, %v849_v50  ;;  %vm394_vm6 = vcmp.eq.f32.partialorder %v2298_v27, inf }
  0xbb   :  { %v2363_v19 = vpop.xlane.xlu0 %271  ;;  %v381_v35 = vsel %vm380_vm13, %v2270_v3, %v379_v22  ;;  %v603_v6 = vmul.f32 %v1657_v34, %v2281_v14  ;;  %1680 = vrsqrt.f32 %v2361_v18  ;;  %1581 = vmatprep.mubr.msk.bf16.mxu1 %vm143_vm0, %v992_v2  ;;  %v791_v54 = vmax.f32 %v391_v46, 1e-12 }
  0xbc   :  { %v1659_v42 = vpop.eup %1658  ;;  %v612_v0 = vsel %vm611_vm15, %v2279_v13, %v610_v28  ;;  %v384_v47 = vsel %vm382_vm14, %v383_v7, %v381_v35  ;;  %1549 = vmatprep.mubr.msk.bf16.mxu0 %vm143_vm0, %v976_v45  ;;  %1682 = vrcp.f32 %v788_v21  ;;  %vm396_vm7 = vcmp.eq.f32.partialorder %v2298_v27, 0.0 }
  0xbd   :  { %v1661_v32 = vpop.eup %1660  ;;  %v400_v51 = vmul.f32 %v1659_v42, %v2296_v26  ;;  %v605_v52 = vsel %vm604_vm2, %v2281_v14, %v603_v6  ;;  %v615_v55 = vsel %vm613_vm1, %v614_v15, %v612_v0  ;;  %1684 = vrsqrt.f32 %v2363_v19 }
  0xbe   :  { %v2388_v38 = vpop.xlane.xlu1 %184  ;;  %v1663_v63 = vpop.eup %1662  ;;  %1686 = vrcp.f32 %v821_v30  ;;  %v790_v60 = vmax.f32 %v384_v47, 1e-12  ;;  %v397_v61 = vand.u32 2147483648, %v2298_v27  ;;  %v608_v62 = vsel %vm606_vm3, %v607_v23, %v605_v52 }
  0xbf   :  { %v2390_v41 = vpop.xlane.xlu0 %181  ;;  %v393_v56 = vmul.f32 %v1663_v63, %v2298_v27  ;;  %v402_v4 = vsel %vm401_vm4, %v2296_v26, %v400_v51  ;;  %v853_v5 = vmul.f32 %v1661_v32, %v1986_v9  ;;  %1688 = vrcp.f32 %v820_v49 }
  0xc0   :  { %v1665_v53 = vpop.eup %1664  ;;  %v823_v10 = vmax.f32 %v615_v55, 1e-12  ;;  %vm625_vm8 = vcmp.eq.f32.partialorder %v2317_v43, inf  ;;  %1690 = vrcp.f32 %v791_v54  ;;  %vm627_vm9 = vcmp.eq.f32.partialorder %v2317_v43, 0.0  ;;  %v1874_v54 = vld [vmem:[%s3518_s0 + $0x20] sm:$0xff] }
  0xc1   :  { %v1667_v59 = vpop.eup %1666  ;;  %v624_v13 = vmul.f32 %v1665_v53, %v2317_v43  ;;  %v395_v39 = vsel %vm394_vm6, %v2298_v27, %v393_v56  ;;  %v628_v40 = vand.u32 2147483648, %v2317_v43  ;;  %v822_v20 = vmax.f32 %v608_v62, 1e-12  ;;  %v1875_v56 = vld [vmem:[%s3518_s0 + $0x28] sm:$0xff] }
  0xc2   :  { %v2412_v3 = vpop.xlane.xlu1 %280  ;;  %v1669_v7 = vpop.eup %1668  ;;  %v855_v9 = vmul.f32 %v1667_v59, %v1981_v8  ;;  %v405_v21 = vsel %vm403_vm5, %v404_v48, %v402_v4  ;;  %vm618_vm10 = vcmp.eq.f32.partialorder %v2319_v44, inf  ;;  %1692 = vrsqrt.f32 %v2388_v38 }
  0xc3   :  { %v2414_v33 = vpop.xlane.xlu0 %277  ;;  %v1671_v12 = vpop.eup %1670  ;;  %1694 = vrcp.f32 %v790_v60  ;;  %v398_v23 = vsel %vm396_vm7, %v397_v61, %v395_v39  ;;  %v626_v24 = vsel %vm625_vm8, %v2317_v43, %v624_v13  ;;  %vm620_vm11 = vcmp.eq.f32.partialorder %v2319_v44, 0.0 }
  0xc4   :  { %v1673_v15 = vpop.eup %1672  ;;  %v977_v25 = vpack.c.bf16 %v855_v9, %v853_v5  ;;  %1696 = vrcp.f32 %v823_v10  ;;  %v621_v26 = vand.u32 2147483648, %v2319_v44  ;;  %vm415_vm12 = vcmp.eq.f32.partialorder %v2339_v57, inf  ;;  %v1876_v9 = vld [vmem:[%s3518_s0 + $0x120] sm:$0xff] }
  0xc5   :  { %v1675_v22 = vpop.eup %1674  ;;  %v793_v27 = vmax.f32 %v405_v21, 1e-12  ;;  %v617_v31 = vmul.f32 %v1673_v15, %v2319_v44  ;;  %vm417_vm13 = vcmp.eq.f32.partialorder %v2339_v57, 0.0  ;;  %v418_v34 = vand.u32 2147483648, %v2339_v57 }
  0xc6   :  { %v2433_v11 = vpop.xlane.xlu1 %190  ;;  %v1677_v8 = vpop.eup %1676  ;;  %1550 = vmatmul.mubr.msk.bf16.vlgmr.msra.gmra.mxu0 %vm143_vm0, %v977_v25  ;;  %1698 = vrsqrt.f32 %v2390_v41  ;;  %v792_v35 = vmax.f32 %v398_v23, 1e-12  ;;  %v629_v36 = vsel %vm627_vm9, %v628_v40, %v626_v24  ;;  %vm408_vm14 = vcmp.eq.f32.partialorder %v2341_v58, inf }
  0xc7   :  { %v2435_v14 = vpop.xlane.xlu0 %187  ;;  %v1679_v50 = vpop.eup %1678  ;;  %1700 = vrcp.f32 %v822_v20  ;;  %v414_v42 = vmul.f32 %v1675_v22, %v2339_v57  ;;  %v407_v30 = vmul.f32 %v1677_v8, %v2341_v58  ;;  %v917_v1 = vmul.f32 %v1671_v12, %v2004_v17  ;;  %v1877_v20 = vld [vmem:[%s3518_s0 + $0x128] sm:$0xff] }
  0xc8   :  { %v1681_v37 = vpop.eup %1680  ;;  %v919_v6 = vmul.f32 %v1669_v7, %v1999_v16  ;;  %vm410_vm15 = vcmp.eq.f32.partialorder %v2341_v58, 0.0  ;;  %v411_v45 = vand.u32 2147483648, %v2341_v58  ;;  %vm639_vm1 = vcmp.eq.f32.partialorder %v2361_v18, inf }
  0xc9   :  { %1702 = vrsqrt.f32 %v2412_v3  ;;  %v1683_v46 = vpop.eup %1682  ;;  %v825_v0 = vmax.f32 %v629_v36, 1e-12  ;;  %v619_v2 = vsel %vm618_vm10, %v2319_v44, %v617_v31  ;;  %v638_v47 = vmul.f32 %v1681_v37, %v2361_v18  ;;  %v1879_v37 = vld [vmem:[%s3518_s0 + $0x38] sm:$0xff] }
  0xca   :  { %v2452_v28 = vpop.xlane.xlu1 %286  ;;  %1704 = vrcp.f32 %v793_v27  ;;  %v993_v17 = vpack.c.bf16 %v919_v6, %v917_v1  ;;  %v1685_v16 = vpop.eup %1684  ;;  %vm641_vm2 = vcmp.eq.f32.partialorder %v2361_v18, 0.0  ;;  %v642_v51 = vand.u32 2147483648, %v2361_v18 }
  0xcb   :  { %v2454_v29 = vpop.xlane.xlu0 %283  ;;  %1706 = vrcp.f32 %v792_v35  ;;  %v1687_v48 = vpop.eup %1686  ;;  %v416_v63 = vsel %vm415_vm12, %v2339_v57, %v414_v42  ;;  %v409_v49 = vsel %vm408_vm14, %v2341_v58, %v407_v30  ;;  %v631_v52 = vmul.f32 %v1685_v16, %v2363_v19 }
  0xcc   :  { %1582 = vmatmul.mubr.msk.bf16.vlgmr.msra.gmra.mxu1 %vm143_vm0, %v993_v17  ;;  %1708 = vrsqrt.f32 %v2414_v33  ;;  %v622_v53 = vsel %vm620_vm11, %v621_v26, %v619_v2  ;;  %v857_v55 = vmul.f32 %v1874_v54, %v1683_v46  ;;  %v859_v59 = vmul.f32 %v1875_v56, %v1679_v50  ;;  %v1689_v60 = vpop.eup %1688 }
  0xcd   :  { %1710 = vrsqrt.f32 %v2433_v11  ;;  %vm632_vm3 = vcmp.eq.f32.partialorder %v2363_v19, inf  ;;  %vm634_vm4 = vcmp.eq.f32.partialorder %v2363_v19, 0.0  ;;  %v635_v44 = vand.u32 2147483648, %v2363_v19  ;;  %v1691_v62 = vpop.eup %1690 }
  0xce   :  { %v2472_v43 = vpop.xlane.xlu1 %196  ;;  %1712 = vrcp.f32 %v825_v0  ;;  %v419_v4 = vsel %vm417_vm13, %v418_v34, %v416_v63  ;;  %v412_v13 = vsel %vm410_vm15, %v411_v45, %v409_v49  ;;  %v640_v5 = vsel %vm639_vm1, %v2361_v18, %v638_v47  ;;  %v1880_v63 = vld [vmem:[%s3518_s0 + $0x130] sm:$0xff] }
  0xcf   :  { %v2477_v32 = vpop.xlane.xlu0 %193  ;;  %v978_v7 = vpack.c.bf16 %v859_v59, %v857_v55  ;;  %v1693_v10 = vpop.eup %1692  ;;  %v824_v39 = vmax.f32 %v622_v53, 1e-12  ;;  %v633_v12 = vsel %vm632_vm3, %v2363_v19, %v631_v52  ;;  %vm429_vm5 = vcmp.eq.f32.partialorder %v2388_v38, inf  ;;  %v1878_v19 = vld [vmem:[%s3518_s0 + $0x30] sm:$0xff]  ;;  %v1881_v52 = vld [vmem:[%s3518_s0 + $0x138] sm:$0xff] }
  0xd0   :  { %1714 = vrsqrt.f32 %v2435_v14  ;;  %v1695_v57 = vpop.eup %1694  ;;  %vm431_vm6 = vcmp.eq.f32.partialorder %v2388_v38, 0.0  ;;  %v432_v58 = vand.u32 2147483648, %v2388_v38  ;;  %v921_v15 = vmul.f32 %v1876_v9, %v1689_v60 }
  0xd1   :  { %1553 = vmatprep.mubr.msk.bf16.mxu0 %vm143_vm0, %v978_v7  ;;  %v923_v21 = vmul.f32 %v1877_v20, %v1687_v48  ;;  %1716 = vrsqrt.f32 %v2452_v28  ;;  %v1697_v22 = vpop.eup %1696  ;;  %v795_v23 = vmax.f32 %v419_v4, 1e-12  ;;  %v794_v24 = vmax.f32 %v412_v13, 1e-12  ;;  %v1882_v20 = vld [vmem:[%s3518_s0 + $0x40] sm:$0xff] }
  0xd2   :  { %v2503_v61 = vpop.xlane.xlu1 %292  ;;  %v643_v25 = vsel %vm641_vm2, %v642_v51, %v640_v5  ;;  %vm422_vm7 = vcmp.eq.f32.partialorder %v2390_v41, inf  ;;  %v636_v26 = vsel %vm634_vm4, %v635_v44, %v633_v12  ;;  %v428_v50 = vmul.f32 %v1693_v10, %v2388_v38 }
  0xd3   :  { %v2515_v40 = vpop.xlane.xlu0 %289  ;;  %v1699_v8 = vpop.eup %1698  ;;  %v994_v27 = vpack.c.bf16 %v923_v21, %v921_v15  ;;  %1718 = vrsqrt.f32 %v2454_v29  ;;  %vm424_vm8 = vcmp.eq.f32.partialorder %v2390_v41, 0.0  ;;  %v425_v34 = vand.u32 2147483648, %v2390_v41 }
  0xd4   :  { %v1701_v31 = vpop.eup %1700  ;;  %1720 = vrcp.f32 %v824_v39  ;;  %vm653_vm9 = vcmp.eq.f32.partialorder %v2412_v3, inf  ;;  %v827_v35 = vmax.f32 %v643_v25, 1e-12  ;;  %v861_v36 = vmul.f32 %v1878_v19, %v1695_v57  ;;  %v1883_v25 = vld [vmem:[%s3518_s0 + $0x48] sm:$0xff] }
  0xd5   :  { %1585 = vmatprep.mubr.msk.bf16.mxu1 %vm143_vm0, %v994_v27  ;;  %v863_v42 = vmul.f32 %v1879_v37, %v1691_v62  ;;  %1722 = vrsqrt.f32 %v2472_v43  ;;  %v826_v1 = vmax.f32 %v636_v26, 1e-12  ;;  %v421_v6 = vmul.f32 %v1699_v8, %v2390_v41 }
  0xd6   :  { %v2537_v18 = vpop.xlane.xlu1 %202  ;;  %v1703_v30 = vpop.eup %1702  ;;  %1724 = vrcp.f32 %v795_v23  ;;  %vm655_vm10 = vcmp.eq.f32.partialorder %v2412_v3, 0.0  ;;  %v430_v0 = vsel %vm429_vm5, %v2388_v38, %v428_v50  ;;  %v656_v47 = vand.u32 2147483648, %v2412_v3 }
  0xd7   :  { %v2549_v45 = vpop.xlane.xlu0 %199  ;;  %v1705_v46 = vpop.eup %1704  ;;  %1726 = vrcp.f32 %v794_v24  ;;  %v652_v2 = vmul.f32 %v1703_v30, %v2412_v3  ;;  %v979_v17 = vpack.c.bf16 %v863_v42, %v861_v36  ;;  %vm646_vm11 = vcmp.eq.f32.partialorder %v2414_v33, inf }
  0xd8   :  { %v1707_v16 = vpop.eup %1706  ;;  %v649_v51 = vand.u32 2147483648, %v2414_v33  ;;  %1728 = vrsqrt.f32 %v2477_v32  ;;  %vm648_vm12 = vcmp.eq.f32.partialorder %v2414_v33, 0.0  ;;  %vm443_vm13 = vcmp.eq.f32.partialorder %v2433_v11, inf }
  0xd9   :  { %v1709_v48 = vpop.eup %1708  ;;  %1730 = vrcp.f32 %v827_v35  ;;  %1554 = vmatmul.mubr.msk.bf16.gmra.mxu0 %vm143_vm0, %v979_v17  ;;  %v925_v49 = vmul.f32 %v1880_v63, %v1701_v31  ;;  %v927_v53 = vmul.f32 %v1881_v52, %v1697_v22  ;;  %v433_v55 = vsel %vm431_vm6, %v432_v58, %v430_v0 }
  0xda   :  { %v1711_v54 = vpop.eup %1710  ;;  %1732 = vrcp.f32 %v826_v1  ;;  %v423_v56 = vsel %vm422_vm7, %v2390_v41, %v421_v6  ;;  %v446_v59 = vand.u32 2147483648, %v2433_v11  ;;  %v2574_v60 = vpop.xlane.xlu1 %298  ;;  %v654_v62 = vsel %vm653_vm9, %v2412_v3, %v652_v2 }
  0xdb   :  { %v2576_v44 = vpop.eup %1712  ;;  %v645_v4 = vmul.f32 %v1709_v48, %v2414_v33  ;;  %vm445_vm14 = vcmp.eq.f32.partialorder %v2433_v11, 0.0  ;;  %v995_v38 = vpack.c.bf16 %v927_v53, %v925_v49  ;;  %1734 = vrsqrt.f32 %v2503_v61  ;;  %v2588_v5 = vpop.xlane.xlu0 %295  ;;  %v1884_v53 = vld [vmem:[%s3518_s0 + $0x140] sm:$0xff] }
  0xdc   :  { %vm436_vm15 = vcmp.eq.f32.partialorder %v2435_v14, inf  ;;  %vm438_vm1 = vcmp.eq.f32.partialorder %v2435_v14, 0.0  ;;  %v439_v13 = vand.u32 2147483648, %v2435_v14  ;;  %1736 = vrsqrt.f32 %v2515_v40 }
  0xdd   :  { %v1715_v7 = vpop.eup %1714  ;;  %v797_v10 = vmax.f32 %v433_v55, 1e-12  ;;  %v426_v39 = vsel %vm424_vm8, %v425_v34, %v423_v56  ;;  %v442_v12 = vmul.f32 %v1711_v54, %v2433_v11  ;;  %vm667_vm2 = vcmp.eq.f32.partialorder %v2452_v28, inf  ;;  %1586 = vmatmul.mubr.msk.bf16.gmra.mxu1 %vm143_vm0, %v995_v38  ;;  %v1885_v55 = vld [vmem:[%s3518_s0 + $0x148] sm:$0xff] }
  0xde   :  { %v1717_v57 = vpop.eup %1716  ;;  %v657_v58 = vsel %vm655_vm10, %v656_v47, %v654_v62  ;;  %v435_v9 = vmul.f32 %v1715_v7, %v2435_v14  ;;  %vm669_vm3 = vcmp.eq.f32.partialorder %v2452_v28, 0.0  ;;  %v670_v15 = vand.u32 2147483648, %v2452_v28  ;;  %v2613_v26 = vpop.xlane.xlu1 %208 }
  0xdf   :  { %v647_v41 = vsel %vm646_vm11, %v2414_v33, %v645_v4  ;;  %vm660_vm4 = vcmp.eq.f32.partialorder %v2454_v29, inf  ;;  %vm662_vm5 = vcmp.eq.f32.partialorder %v2454_v29, 0.0  ;;  %v865_v3 = vmul.f32 %v1882_v20, %v1707_v16  ;;  %v2625_v42 = vpop.xlane.xlu0 %205 }
  0xe0   :  { %v1719_v21 = vpop.eup %1718  ;;  %v796_v22 = vmax.f32 %v426_v39, 1e-12  ;;  %v666_v23 = vmul.f32 %v1717_v57, %v2452_v28  ;;  %v663_v24 = vand.u32 2147483648, %v2454_v29  ;;  %v867_v8 = vmul.f32 %v1883_v25, %v1705_v46 }
  0xe1   :  { %v1721_v50 = vpop.eup %1720  ;;  %1738 = vrcp.f32 %v797_v10  ;;  %v829_v27 = vmax.f32 %v657_v58, 1e-12  ;;  %v444_v31 = vsel %vm443_vm13, %v2433_v11, %v442_v12  ;;  %v659_v34 = vmul.f32 %v1719_v21, %v2454_v29 }
  0xe2   :  { %v1723_v35 = vpop.eup %1722  ;;  %v650_v19 = vsel %vm648_vm12, %v649_v51, %v647_v41  ;;  %v437_v36 = vsel %vm436_vm15, %v2435_v14, %v435_v9  ;;  %v980_v37 = vpack.c.bf16 %v867_v8, %v865_v3  ;;  %1740 = vrsqrt.f32 %v2537_v18  ;;  %v2650_v63 = vpop.xlane.xlu1 %304  ;;  %v1886_v9 = vld [vmem:[%s3518_s0 + $0x50] sm:$0xff]  ;;  %v1887_v3 = vld [vmem:[%s3518_s0 + $0x58] sm:$0xff] }
  0xe3   :  { %v1725_v30 = vpop.eup %1724  ;;  %v456_v1 = vmul.f32 %v1723_v35, %v2472_v43  ;;  %vm457_vm6 = vcmp.eq.f32.partialorder %v2472_v43, inf  ;;  %vm459_vm7 = vcmp.eq.f32.partialorder %v2472_v43, 0.0  ;;  %v460_v6 = vand.u32 2147483648, %v2472_v43  ;;  %v1888_v35 = vld [vmem:[%s3518_s0 + $0x150] sm:$0xff] }
  0xe4   :  { %v1727_v33 = vpop.eup %1726  ;;  %1742 = vrcp.f32 %v796_v22  ;;  %v447_v46 = vsel %vm445_vm14, %v446_v59, %v444_v31  ;;  %v668_v0 = vsel %vm667_vm2, %v2452_v28, %v666_v23  ;;  %vm450_vm8 = vcmp.eq.f32.partialorder %v2477_v32, inf  ;;  %1557 = vmatprep.mubr.msk.bf16.mxu0 %vm143_vm0, %v980_v37  ;;  %v2666_v28 = vpop.xlane.xlu0 %301 }
  0xe5   :  { %v1729_v2 = vpop.eup %1728  ;;  %1744 = vrcp.f32 %v829_v27  ;;  %v828_v17 = vmax.f32 %v650_v19, 1e-12  ;;  %v440_v16 = vsel %vm438_vm1, %v439_v13, %v437_v36  ;;  %v661_v47 = vsel %vm660_vm4, %v2454_v29, %v659_v34 }
  0xe6   :  { %v2643_v11 = vpop.eup %1730  ;;  %v458_v51 = vsel %vm457_vm6, %v2472_v43, %v456_v1  ;;  %vm452_vm9 = vcmp.eq.f32.partialorder %v2477_v32, 0.0  ;;  %v453_v48 = vand.u32 2147483648, %v2477_v32  ;;  %vm681_vm10 = vcmp.eq.f32.partialorder %v2503_v61, inf  ;;  %v2683_v41 = vpop.xlane.xlu1 %214 }
  0xe7   :  { %1746 = vrsqrt.f32 %v2549_v45  ;;  %v1733_v14 = vpop.eup %1732  ;;  %v799_v49 = vmax.f32 %v447_v46, 1e-12  ;;  %v671_v52 = vsel %vm669_vm3, %v670_v15, %v668_v0  ;;  %v929_v54 = vmul.f32 %v1884_v53, %v1721_v50  ;;  %v1891_v53 = vld [vmem:[%s3518_s0 + $0x68] sm:$0xff] }
  0xe8   :  { %v931_v56 = vmul.f32 %v1885_v55, %v2576_v44  ;;  %v1735_v59 = vpop.eup %1734  ;;  %v798_v62 = vmax.f32 %v440_v16, 1e-12  ;;  %v664_v4 = vsel %vm662_vm5, %v663_v24, %v661_v47  ;;  %v449_v38 = vmul.f32 %v1729_v2, %v2477_v32  ;;  %v2697_v25 = vpop.xlane.xlu0 %211 }
  0xe9   :  { %vm683_vm11 = vcmp.eq.f32.partialorder %v2503_v61, 0.0  ;;  %1748 = vrsqrt.f32 %v2574_v60  ;;  %v1737_v13 = vpop.eup %1736  ;;  %v461_v7 = vsel %vm459_vm7, %v460_v6, %v458_v51  ;;  %v684_v44 = vand.u32 2147483648, %v2503_v61 }
  0xea   :  { %1750 = vrcp.f32 %v828_v17  ;;  %v996_v10 = vpack.c.bf16 %v931_v56, %v929_v54  ;;  %v831_v39 = vmax.f32 %v671_v52, 1e-12  ;;  %v680_v29 = vmul.f32 %v1735_v59, %v2503_v61 }
  0xeb   :  { %vm674_vm12 = vcmp.eq.f32.partialorder %v2515_v40, inf  ;;  %1752 = vrsqrt.f32 %v2588_v5  ;;  %v830_v12 = vmax.f32 %v664_v4, 1e-12  ;;  %v673_v57 = vmul.f32 %v1737_v13, %v2515_v40 }
  0xec   :  { %1754 = vrcp.f32 %v799_v49  ;;  %vm676_vm13 = vcmp.eq.f32.partialorder %v2515_v40, 0.0  ;;  %1589 = vmatprep.mubr.msk.bf16.mxu1 %vm143_vm0, %v996_v10  ;;  %v801_v43 = vmax.f32 %v461_v7, 1e-12  ;;  %v451_v58 = vsel %vm450_vm8, %v2477_v32, %v449_v38 }
  0xed   :  { %1756 = vrcp.f32 %v798_v62  ;;  %v869_v15 = vmul.f32 %v1886_v9, %v1727_v33  ;;  %v677_v20 = vand.u32 2147483648, %v2515_v40  ;;  %vm471_vm14 = vcmp.eq.f32.partialorder %v2537_v18, inf }
  0xee   :  { %v871_v21 = vmul.f32 %v1887_v3, %v1725_v30  ;;  %1758 = vrsqrt.f32 %v2613_v26  ;;  %v1739_v22 = vpop.eup %1738  ;;  %v682_v23 = vsel %vm681_vm10, %v2503_v61, %v680_v29  ;;  %vm473_vm15 = vcmp.eq.f32.partialorder %v2537_v18, 0.0  ;;  %v1889_v30 = vld [vmem:[%s3518_s0 + $0x158] sm:$0xff]  ;;  %v2722_v61 = vpop.xlane.xlu1 %310  ;;  %v1892_v29 = vld [vmem:[%s3518_s0 + $0x160] sm:$0xff] }
  0xef   :  { %1760 = vrcp.f32 %v831_v39  ;;  %v474_v24 = vand.u32 2147483648, %v2537_v18  ;;  %vm464_vm1 = vcmp.eq.f32.partialorder %v2549_v45, inf  ;;  %v1741_v8 = vpop.eup %1740  ;;  %v454_v50 = vsel %vm452_vm9, %v453_v48, %v451_v58  ;;  %v2735_v48 = vpop.xlane.xlu0 %307 }
  0xf0   :  { %1762 = vrcp.f32 %v830_v12  ;;  %v675_v27 = vsel %vm674_vm12, %v2515_v40, %v673_v57  ;;  %v981_v31 = vpack.c.bf16 %v871_v21, %v869_v15  ;;  %v470_v34 = vmul.f32 %v1741_v8, %v2537_v18  ;;  %v1893_v57 = vld [vmem:[%s3518_s0 + $0x168] sm:$0xff] }
  0xf1   :  { %1764 = vrcp.f32 %v801_v43  ;;  %vm466_vm2 = vcmp.eq.f32.partialorder %v2549_v45, 0.0  ;;  %v933_v19 = vmul.f32 %v1888_v35, %v1733_v14  ;;  %v1743_v36 = vpop.eup %1742  ;;  %v685_v32 = vsel %vm683_vm11, %v684_v44, %v682_v23 }
  0xf2   :  { %v467_v37 = vand.u32 2147483648, %v2549_v45  ;;  %1558 = vmatmul.mubr.msk.bf16.gmra.mxu0 %vm143_vm0, %v981_v31  ;;  %1766 = vrsqrt.f32 %v2625_v42  ;;  %v935_v1 = vmul.f32 %v1889_v30, %v2643_v11  ;;  %v1745_v6 = vpop.eup %1744  ;;  %v800_v33 = vmax.f32 %v454_v50, 1e-12  ;;  %v1890_v11 = vld [vmem:[%s3518_s0 + $0x60] sm:$0xff]  ;;  %v2756_v10 = vpop.xlane.xlu1 %220 }
  0xf3   :  { %v678_v46 = vsel %vm676_vm13, %v677_v20, %v675_v27  ;;  %vm695_vm3 = vcmp.eq.f32.partialorder %v2574_v60, inf  ;;  %1768 = vrsqrt.f32 %v2650_v63  ;;  %v698_v2 = vand.u32 2147483648, %v2574_v60  ;;  %v2773_v20 = vpop.xlane.xlu0 %217 }
  0xf4   :  { %v1747_v0 = vpop.eup %1746  ;;  %vm688_vm4 = vcmp.eq.f32.partialorder %v2588_v5, inf  ;;  %v997_v17 = vpack.c.bf16 %v935_v1, %v933_v19  ;;  %1770 = vrsqrt.f32 %v2666_v28  ;;  %v833_v16 = vmax.f32 %v685_v32, 1e-12  ;;  %v1894_v32 = vld [vmem:[%s3518_s0 + $0x70] sm:$0xff] }
  0xf5   :  { %v472_v40 = vsel %vm471_vm14, %v2537_v18, %v470_v34  ;;  %v463_v47 = vmul.f32 %v1747_v0, %v2549_v45  ;;  %vm697_vm5 = vcmp.eq.f32.partialorder %v2574_v60, 0.0  ;;  %v873_v51 = vmul.f32 %v1890_v11, %v1743_v36 }
  0xf6   :  { %v1749_v14 = vpop.eup %1748  ;;  %v832_v49 = vmax.f32 %v678_v46, 1e-12  ;;  %vm690_vm6 = vcmp.eq.f32.partialorder %v2588_v5, 0.0  ;;  %v691_v52 = vand.u32 2147483648, %v2588_v5  ;;  %1590 = vmatmul.mubr.msk.bf16.gmra.mxu1 %vm143_vm0, %v997_v17  ;;  %v875_v54 = vmul.f32 %v1891_v53, %v1739_v22  ;;  %v2807_v30 = vpop.xlane.xlu1 %316 }
  0xf7   :  { %1772 = vrsqrt.f32 %v2683_v41  ;;  %v1751_v55 = vpop.eup %1750  ;;  %v465_v56 = vsel %vm464_vm1, %v2549_v45, %v463_v47  ;;  %v694_v59 = vmul.f32 %v1749_v14, %v2574_v60  ;;  %vm485_vm7 = vcmp.eq.f32.partialorder %v2613_v26, inf }
  0xf8   :  { %1774 = vrcp.f32 %v800_v33  ;;  %v1753_v62 = vpop.eup %1752  ;;  %v475_v4 = vsel %vm473_vm15, %v474_v24, %v472_v40  ;;  %vm487_vm8 = vcmp.eq.f32.partialorder %v2613_v26, 0.0  ;;  %v982_v38 = vpack.c.bf16 %v875_v54, %v873_v51  ;;  %v1895_v33 = vld [vmem:[%s3518_s0 + $0x78] sm:$0xff] }
  0xf9   :  { %1776 = vrsqrt.f32 %v2697_v25  ;;  %v1755_v13 = vpop.eup %1754  ;;  %v687_v7 = vmul.f32 %v1753_v62, %v2588_v5  ;;  %v488_v44 = vand.u32 2147483648, %v2613_v26  ;;  %vm478_vm9 = vcmp.eq.f32.partialorder %v2625_v42, inf }
  0xfa   :  { %1778 = vrcp.f32 %v833_v16  ;;  %v1757_v39 = vpop.eup %1756  ;;  %v468_v18 = vsel %vm466_vm2, %v467_v37, %v465_v56  ;;  %vm480_vm10 = vcmp.eq.f32.partialorder %v2625_v42, 0.0  ;;  %1561 = vmatprep.mubr.msk.bf16.mxu0 %vm143_vm0, %v982_v38  ;;  %v937_v12 = vmul.f32 %v1892_v29, %v1751_v55  ;;  %v2819_v16 = vpop.xlane.xlu0 %313 }
  0xfb   :  { %1780 = vrcp.f32 %v832_v49  ;;  %v939_v43 = vmul.f32 %v1893_v57, %v1745_v6  ;;  %v1759_v58 = vpop.eup %1758  ;;  %v803_v9 = vmax.f32 %v475_v4, 1e-12  ;;  %v696_v45 = vsel %vm695_vm3, %v2574_v60, %v694_v59  ;;  %v2843_v4 = vpop.xlane.xlu1 %226 }
  0xfc   :  { %v481_v15 = vand.u32 2147483648, %v2625_v42  ;;  %vm709_vm11 = vcmp.eq.f32.partialorder %v2650_v63, inf  ;;  %v2775_v3 = vpop.eup %1760  ;;  %v689_v21 = vsel %vm688_vm4, %v2588_v5, %v687_v7  ;;  %v484_v22 = vmul.f32 %v1759_v58, %v2613_v26 }
  0xfd   :  { %vm711_vm12 = vcmp.eq.f32.partialorder %v2650_v63, 0.0  ;;  %v998_v23 = vpack.c.bf16 %v939_v43, %v937_v12  ;;  %1782 = vrsqrt.f32 %v2722_v61  ;;  %v2783_v24 = vpop.eup %1762  ;;  %v802_v8 = vmax.f32 %v468_v18, 1e-12  ;;  %v1896_v18 = vld [vmem:[%s3518_s0 + $0x170] sm:$0xff]  ;;  %v1897_v12 = vld [vmem:[%s3518_s0 + $0x178] sm:$0xff] }
  0xfe   :  { %v712_v50 = vand.u32 2147483648, %v2650_v63  ;;  %vm702_vm13 = vcmp.eq.f32.partialorder %v2666_v28, inf  ;;  %v705_v27 = vand.u32 2147483648, %v2666_v28  ;;  %v2788_v31 = vpop.eup %1764  ;;  %v699_v34 = vsel %vm697_vm5, %v698_v2, %v696_v45 }
  0xff   :  { %v486_v35 = vsel %vm485_vm7, %v2613_v26, %v484_v22  ;;  %vm704_vm14 = vcmp.eq.f32.partialorder %v2666_v28, 0.0  ;;  %vm499_vm15 = vcmp.eq.f32.partialorder %v2683_v41, inf  ;;  %1593 = vmatprep.mubr.msk.bf16.mxu1 %vm143_vm0, %v998_v23  ;;  %1784 = vrsqrt.f32 %v2735_v48  ;;  %v1767_v19 = vpop.eup %1766 }
 0x100   :  { %1786 = vrcp.f32 %v803_v9  ;;  %v692_v36 = vsel %vm690_vm6, %v691_v52, %v689_v21  ;;  %v502_v60 = vand.u32 2147483648, %v2683_v41  ;;  %v877_v37 = vmul.f32 %v1894_v32, %v1757_v39  ;;  %v1769_v1 = vpop.eup %1768  ;;  %v1899_v32 = vld [vmem:[%s3518_s0 + $0x88] sm:$0xff] }
 0x101   :  { %v477_v6 = vmul.f32 %v1767_v19, %v2625_v42  ;;  %vm492_vm1 = vcmp.eq.f32.partialorder %v2697_v25, inf  ;;  %v879_v5 = vmul.f32 %v1895_v33, %v1755_v13  ;;  %1788 = vrsqrt.f32 %v2756_v10  ;;  %v1771_v46 = vpop.eup %1770 }
 0x102   :  { %1790 = vrcp.f32 %v802_v8  ;;  %v835_v0 = vmax.f32 %v699_v34, 1e-12  ;;  %v489_v2 = vsel %vm487_vm8, %v488_v44, %v486_v35  ;;  %v708_v17 = vmul.f32 %v1769_v1, %v2650_v63 }
 0x103   :  { %vm501_vm2 = vcmp.eq.f32.partialorder %v2683_v41, 0.0  ;;  %v834_v40 = vmax.f32 %v692_v36, 1e-12  ;;  %v479_v47 = vsel %vm478_vm9, %v2625_v42, %v477_v6  ;;  %v701_v11 = vmul.f32 %v1771_v46, %v2666_v28 }
 0x104   :  { %vm494_vm3 = vcmp.eq.f32.partialorder %v2697_v25, 0.0  ;;  %v983_v51 = vpack.c.bf16 %v879_v5, %v877_v37  ;;  %v1773_v14 = vpop.eup %1772  ;;  %v482_v26 = vsel %vm480_vm10, %v481_v15, %v479_v47  ;;  %v710_v49 = vsel %vm709_vm11, %v2650_v63, %v708_v17 }
 0x105   :  { %v495_v52 = vand.u32 2147483648, %v2697_v25  ;;  %1792 = vrsqrt.f32 %v2773_v20  ;;  %v1775_v53 = vpop.eup %1774  ;;  %v805_v54 = vmax.f32 %v489_v2, 1e-12  ;;  %v703_v55 = vsel %vm702_vm13, %v2666_v28, %v701_v11  ;;  %v2865_v28 = vpop.xlane.xlu0 %223 }
 0x106   :  { %v498_v56 = vmul.f32 %v1773_v14, %v2683_v41  ;;  %vm723_vm4 = vcmp.eq.f32.partialorder %v2722_v61, inf  ;;  %1562 = vmatmul.mubr.msk.bf16.gmra.mxu0 %vm143_vm0, %v983_v51  ;;  %v1777_v42 = vpop.eup %1776  ;;  %1794 = vrcp.f32 %v835_v0  ;;  %v713_v59 = vsel %vm711_vm12, %v712_v50, %v710_v49  ;;  %v2885_v50 = vpop.xlane.xlu1 %322 }
 0x107   :  { %vm725_vm5 = vcmp.eq.f32.partialorder %v2722_v61, 0.0  ;;  %v726_v62 = vand.u32 2147483648, %v2722_v61  ;;  %v2845_v38 = vpop.eup %1778  ;;  %1796 = vrcp.f32 %v834_v40  ;;  %v804_v13 = vmax.f32 %v482_v26, 1e-12  ;;  %v1900_v26 = vld [vmem:[%s3518_s0 + $0x180] sm:$0xff] }
 0x108   :  { %v491_v7 = vmul.f32 %v1777_v42, %v2697_v25  ;;  %vm716_vm6 = vcmp.eq.f32.partialorder %v2735_v48, inf  ;;  %v2849_v44 = vpop.eup %1780  ;;  %v706_v63 = vsel %vm704_vm14, %v705_v27, %v703_v55  ;;  %v500_v39 = vsel %vm499_vm15, %v2683_v41, %v498_v56 }
 0x109   :  { %vm718_vm7 = vcmp.eq.f32.partialorder %v2735_v48, 0.0  ;;  %v941_v29 = vmul.f32 %v1896_v18, %v2783_v24  ;;  %v943_v57 = vmul.f32 %v1897_v12, %v2775_v3  ;;  %1798 = vrcp.f32 %v805_v54  ;;  %v2901_v1 = vpop.xlane.xlu0 %319 }
 0x10a   :  { %v837_v43 = vmax.f32 %v713_v59, 1e-12  ;;  %v493_v58 = vsel %vm492_vm1, %v2697_v25, %v491_v7  ;;  %v719_v9 = vand.u32 2147483648, %v2735_v48  ;;  %v1783_v45 = vpop.eup %1782  ;;  %vm513_vm8 = vcmp.eq.f32.partialorder %v2756_v10, inf  ;;  %v1898_v25 = vld [vmem:[%s3518_s0 + $0x80] sm:$0xff]  ;;  %v2920_v51 = vpop.xlane.xlu1 %232 }
 0x10b   :  { %vm515_vm9 = vcmp.eq.f32.partialorder %v2756_v10, 0.0  ;;  %v999_v15 = vpack.c.bf16 %v943_v57, %v941_v29  ;;  %1800 = vrsqrt.f32 %v2807_v30  ;;  %v836_v3 = vmax.f32 %v706_v63, 1e-12 }
 0x10c   :  { %1802 = vrcp.f32 %v804_v13  ;;  %v503_v21 = vsel %vm501_vm2, %v502_v60, %v500_v39  ;;  %v722_v22 = vmul.f32 %v1783_v45, %v2722_v61  ;;  %v1785_v23 = vpop.eup %1784  ;;  %v496_v24 = vsel %vm494_vm3, %v495_v52, %v493_v58  ;;  %v1901_v52 = vld [vmem:[%s3518_s0 + $0x188] sm:$0xff]  ;;  %v1903_v39 = vld [vmem:[%s3518_s0 + $0x98] sm:$0xff] }
 0x10d   :  { %v516_v8 = vand.u32 2147483648, %v2756_v10  ;;  %vm506_vm10 = vcmp.eq.f32.partialorder %v2773_v20, inf  ;;  %1594 = vmatmul.mubr.msk.bf16.gmra.mxu1 %vm143_vm0, %v999_v15  ;;  %1804 = vrsqrt.f32 %v2819_v16  ;;  %v1787_v27 = vpop.eup %1786  ;;  %v715_v34 = vmul.f32 %v1785_v23, %v2735_v48 }
 0x10e   :  { %1806 = vrcp.f32 %v837_v43  ;;  %v724_v41 = vsel %vm723_vm4, %v2722_v61, %v722_v22  ;;  %v881_v35 = vmul.f32 %v1898_v25, %v1775_v53  ;;  %v1789_v19 = vpop.eup %1788  ;;  %v807_v36 = vmax.f32 %v503_v21, 1e-12  ;;  %v2959_v57 = vpop.xlane.xlu1 %328 }
 0x10f   :  { %v727_v60 = vsel %vm725_vm5, %v726_v62, %v724_v41  ;;  %v883_v37 = vmul.f32 %v1899_v32, %v2788_v31  ;;  %1808 = vrsqrt.f32 %v2843_v4  ;;  %v1791_v6 = vpop.eup %1790  ;;  %v806_v33 = vmax.f32 %v496_v24, 1e-12  ;;  %v1905_v41 = vld [vmem:[%s3518_s0 + $0x198] sm:$0xff] }
 0x110   :  { %1810 = vrcp.f32 %v836_v3  ;;  %v717_v5 = vsel %vm716_vm6, %v2735_v48, %v715_v34  ;;  %v512_v61 = vmul.f32 %v1789_v19, %v2756_v10  ;;  %vm508_vm11 = vcmp.eq.f32.partialorder %v2773_v20, 0.0 }
 0x111   :  { %v509_v46 = vand.u32 2147483648, %v2773_v20  ;;  %v984_v0 = vpack.c.bf16 %v883_v37, %v881_v35  ;;  %1812 = vrsqrt.f32 %v2865_v28  ;;  %v839_v2 = vmax.f32 %v727_v60, 1e-12 }
 0x112   :  { %v1793_v31 = vpop.eup %1792  ;;  %v720_v17 = vsel %vm718_vm7, %v719_v9, %v717_v5  ;;  %v514_v40 = vsel %vm513_vm8, %v2756_v10, %v512_v61  ;;  %vm737_vm12 = vcmp.eq.f32.partialorder %v2807_v30, inf  ;;  %1814 = vrcp.f32 %v807_v36  ;;  %v2937_v10 = vpop.xlane.xlu0 %229 }
 0x113   :  { %v505_v47 = vmul.f32 %v1793_v31, %v2773_v20  ;;  %vm739_vm13 = vcmp.eq.f32.partialorder %v2807_v30, 0.0  ;;  %v740_v11 = vand.u32 2147483648, %v2807_v30  ;;  %1565 = vmatprep.mubr.msk.bf16.mxu0 %vm143_vm0, %v984_v0  ;;  %v1795_v14 = vpop.eup %1794  ;;  %1816 = vrcp.f32 %v806_v33 }
 0x114   :  { %v517_v48 = vsel %vm515_vm9, %v516_v8, %v514_v40  ;;  %v945_v49 = vmul.f32 %v1900_v26, %v2849_v44  ;;  %v947_v53 = vmul.f32 %v1901_v52, %v2845_v38  ;;  %v1797_v54 = vpop.eup %1796  ;;  %v838_v55 = vmax.f32 %v720_v17, 1e-12  ;;  %v1902_v44 = vld [vmem:[%s3518_s0 + $0x90] sm:$0xff]  ;;  %v1907_v26 = vld [vmem:[%s3518_s0 + $0xa8] sm:$0xff] }
 0x115   :  { %v507_v56 = vsel %vm506_vm10, %v2773_v20, %v505_v47  ;;  %vm730_vm14 = vcmp.eq.f32.partialorder %v2819_v16, inf  ;;  %1818 = vrsqrt.f32 %v2885_v50  ;;  %vm732_vm15 = vcmp.eq.f32.partialorder %v2819_v16, 0.0  ;;  %v1904_v8 = vld [vmem:[%s3518_s0 + $0x190] sm:$0xff] }
 0x116   :  { %1820 = vrcp.f32 %v839_v2  ;;  %v733_v42 = vand.u32 2147483648, %v2819_v16  ;;  %v1000_v59 = vpack.c.bf16 %v947_v53, %v945_v49  ;;  %v2941_v62 = vpop.eup %1798  ;;  %v809_v38 = vmax.f32 %v517_v48, 1e-12  ;;  %v2970_v22 = vpop.xlane.xlu0 %325 }
 0x117   :  { %v510_v13 = vsel %vm508_vm11, %v509_v46, %v507_v56  ;;  %vm527_vm1 = vcmp.eq.f32.partialorder %v2843_v4, inf  ;;  %1822 = vrsqrt.f32 %v2901_v1  ;;  %vm529_vm2 = vcmp.eq.f32.partialorder %v2843_v4, 0.0  ;;  %v3000_v46 = vpop.xlane.xlu1 %238 }
 0x118   :  { %v1801_v7 = vpop.eup %1800  ;;  %1597 = vmatprep.mubr.msk.bf16.mxu1 %vm143_vm0, %v1000_v59  ;;  %v885_v63 = vmul.f32 %v1902_v44, %v1791_v6  ;;  %v887_v20 = vmul.f32 %v1903_v39, %v1787_v27  ;;  %1824 = vrsqrt.f32 %v2920_v51  ;;  %v530_v12 = vand.u32 2147483648, %v2843_v4 }
 0x119   :  { %v1803_v18 = vpop.eup %1802  ;;  %1826 = vrcp.f32 %v838_v55  ;;  %v736_v29 = vmul.f32 %v1801_v7, %v2807_v30  ;;  %vm520_vm3 = vcmp.eq.f32.partialorder %v2865_v28, inf  ;;  %v808_v58 = vmax.f32 %v510_v13, 1e-12 }
 0x11a   :  { %v1805_v43 = vpop.eup %1804  ;;  %vm522_vm4 = vcmp.eq.f32.partialorder %v2865_v28, 0.0  ;;  %v985_v9 = vpack.c.bf16 %v887_v20, %v885_v63  ;;  %1828 = vrsqrt.f32 %v2937_v10  ;;  %v523_v21 = vand.u32 2147483648, %v2865_v28 }
 0x11b   :  { %v2963_v45 = vpop.eup %1806  ;;  %1830 = vrcp.f32 %v809_v38  ;;  %v738_v15 = vsel %vm737_vm12, %v2807_v30, %v736_v29  ;;  %v729_v3 = vmul.f32 %v1805_v43, %v2819_v16  ;;  %vm751_vm5 = vcmp.eq.f32.partialorder %v2885_v50, inf  ;;  %v3040_v38 = vpop.xlane.xlu1 %334 }
 0x11c   :  { %v1809_v23 = vpop.eup %1808  ;;  %v741_v24 = vsel %vm739_vm13, %v740_v11, %v738_v15  ;;  %1566 = vmatmul.mubr.msk.bf16.gmra.mxu0 %vm143_vm0, %v985_v9  ;;  %v949_v27 = vmul.f32 %v1904_v8, %v1797_v54  ;;  %v951_v34 = vmul.f32 %v1905_v41, %v1795_v14  ;;  %1832 = vrsqrt.f32 %v2959_v57  ;;  %v1906_v14 = vld [vmem:[%s3518_s0 + $0xa0] sm:$0xff] }
 0x11d   :  { %v2983_v25 = vpop.eup %1810  ;;  %v841_v30 = vmax.f32 %v741_v24, 1e-12  ;;  %v731_v35 = vsel %vm730_vm14, %v2819_v16, %v729_v3  ;;  %v526_v19 = vmul.f32 %v1809_v23, %v2843_v4  ;;  %vm753_vm6 = vcmp.eq.f32.partialorder %v2885_v50, 0.0 }
 0x11e   :  { %v754_v36 = vand.u32 2147483648, %v2885_v50  ;;  %v1813_v60 = vpop.eup %1812  ;;  %1834 = vrcp.f32 %v808_v58  ;;  %v734_v32 = vsel %vm732_vm15, %v733_v42, %v731_v35  ;;  %vm744_vm7 = vcmp.eq.f32.partialorder %v2901_v1, inf }
 0x11f   :  { %v747_v37 = vand.u32 2147483648, %v2901_v1  ;;  %v1001_v6 = vpack.c.bf16 %v951_v34, %v949_v27  ;;  %1836 = vrcp.f32 %v841_v30  ;;  %v840_v33 = vmax.f32 %v734_v32, 1e-12  ;;  %v3002_v0 = vpop.eup %1814 }
 0x120   :  { %v528_v5 = vsel %vm527_vm1, %v2843_v4, %v526_v19  ;;  %v519_v61 = vmul.f32 %v1813_v60, %v2865_v28  ;;  %vm746_vm8 = vcmp.eq.f32.partialorder %v2901_v1, 0.0  ;;  %vm541_vm9 = vcmp.eq.f32.partialorder %v2920_v51, inf  ;;  %v3010_v31 = vpop.eup %1816  ;;  %v3016_v4 = vpop.xlane.xlu0 %235 }
 0x121   :  { %v531_v16 = vsel %vm529_vm2, %v530_v12, %v528_v5  ;;  %vm543_vm10 = vcmp.eq.f32.partialorder %v2920_v51, 0.0  ;;  %1598 = vmatmul.mubr.msk.bf16.gmra.mxu1 %vm143_vm0, %v1001_v6  ;;  %1838 = vrsqrt.f32 %v2970_v22  ;;  %v544_v40 = vand.u32 2147483648, %v2920_v51  ;;  %v1909_v12 = vld [vmem:[%s3518_s0 + $0x1a8] sm:$0xff] }
 0x122   :  { %1840 = vrcp.f32 %v840_v33  ;;  %v811_v2 = vmax.f32 %v531_v16, 1e-12  ;;  %v521_v17 = vsel %vm520_vm3, %v2865_v28, %v519_v61  ;;  %v1819_v47 = vpop.eup %1818  ;;  %v889_v48 = vmul.f32 %v1906_v14, %v1803_v18  ;;  %v1910_v33 = vld [vmem:[%s3518_s0 + $0xb0] sm:$0xff] }
 0x123   :  { %v524_v11 = vsel %vm522_vm4, %v523_v21, %v521_v17  ;;  %v891_v49 = vmul.f32 %v1907_v26, %v2941_v62  ;;  %1842 = vrsqrt.f32 %v3000_v46  ;;  %v3028_v52 = vpop.eup %1820  ;;  %v750_v28 = vmul.f32 %v1819_v47, %v2885_v50  ;;  %v1915_v26 = vld [vmem:[%s3518_s0 + $0xc8] sm:$0xff] }
 0x124   :  { %1844 = vrcp.f32 %v811_v2  ;;  %v810_v53 = vmax.f32 %v524_v11, 1e-12  ;;  %vm534_vm11 = vcmp.eq.f32.partialorder %v2937_v10, inf  ;;  %v1823_v54 = vpop.eup %1822  ;;  %vm536_vm12 = vcmp.eq.f32.partialorder %v2937_v10, 0.0  ;;  %v3075_v34 = vpop.xlane.xlu0 %331  ;;  %v1912_v2 = vld [vmem:[%s3518_s0 + $0x1b0] sm:$0xff] }
 0x125   :  { %v537_v55 = vand.u32 2147483648, %v2937_v10  ;;  %v986_v56 = vpack.c.bf16 %v891_v49, %v889_v48  ;;  %1846 = vrsqrt.f32 %v3016_v4  ;;  %v1825_v42 = vpop.eup %1824  ;;  %v752_v59 = vsel %vm751_vm5, %v2885_v50, %v750_v28  ;;  %v1908_v50 = vld [vmem:[%s3518_s0 + $0x1a0] sm:$0xff] }
 0x126   :  { %1848 = vrcp.f32 %v810_v53  ;;  %v743_v62 = vmul.f32 %v1823_v54, %v2901_v1  ;;  %vm765_vm13 = vcmp.eq.f32.partialorder %v2959_v57, inf  ;;  %v1827_v13 = vpop.eup %1826  ;;  %v755_v7 = vsel %vm753_vm6, %v754_v36, %v752_v59 }
 0x127   :  { %v540_v44 = vmul.f32 %v1825_v42, %v2920_v51  ;;  %vm767_vm14 = vcmp.eq.f32.partialorder %v2959_v57, 0.0  ;;  %v768_v63 = vand.u32 2147483648, %v2959_v57  ;;  %1569 = vmatprep.mubr.msk.bf16.mxu0 %vm143_vm0, %v986_v56  ;;  %v1829_v39 = vpop.eup %1828  ;;  %v843_v20 = vmax.f32 %v755_v7, 1e-12 }
 0x128   :  { %v745_v18 = vsel %vm744_vm7, %v2901_v1, %v743_v62  ;;  %vm758_vm15 = vcmp.eq.f32.partialorder %v2970_v22, inf  ;;  %v953_v29 = vmul.f32 %v1908_v50, %v2983_v25  ;;  %v955_v43 = vmul.f32 %v1909_v12, %v2963_v45  ;;  %v1831_v58 = vpop.eup %1830 }
 0x129   :  { %v748_v9 = vsel %vm746_vm8, %v747_v37, %v745_v18  ;;  %v542_v15 = vsel %vm541_vm9, %v2920_v51, %v540_v44  ;;  %v533_v3 = vmul.f32 %v1829_v39, %v2937_v10  ;;  %vm760_vm1 = vcmp.eq.f32.partialorder %v2970_v22, 0.0  ;;  %v1833_v21 = vpop.eup %1832 }
 0x12a   :  { %1850 = vrsqrt.f32 %v3040_v38  ;;  %v842_v23 = vmax.f32 %v748_v9, 1e-12  ;;  %v545_v45 = vsel %vm543_vm10, %v544_v40, %v542_v15  ;;  %v1002_v24 = vpack.c.bf16 %v955_v43, %v953_v29  ;;  %v1913_v40 = vld [vmem:[%s3518_s0 + $0x1b8] sm:$0xff] }
 0x12b   :  { %1852 = vrcp.f32 %v843_v20  ;;  %v813_v8 = vmax.f32 %v545_v45, 1e-12  ;;  %v535_v1 = vsel %vm534_vm11, %v2937_v10, %v533_v3  ;;  %v764_v27 = vmul.f32 %v1833_v21, %v2959_v57  ;;  %v1835_v25 = vpop.eup %1834  ;;  %v1918_v20 = vld [vmem:[%s3518_s0 + $0xd0] sm:$0xff]  ;;  %v1919_v29 = vld [vmem:[%s3518_s0 + $0xd8] sm:$0xff] }
 0x12c   :  { %v761_v41 = vand.u32 2147483648, %v2970_v22  ;;  %1854 = vrcp.f32 %v842_v23  ;;  %v538_v30 = vsel %vm536_vm12, %v537_v55, %v535_v1  ;;  %vm555_vm2 = vcmp.eq.f32.partialorder %v3000_v46, inf  ;;  %1601 = vmatprep.mubr.msk.bf16.mxu1 %vm143_vm0, %v1002_v24  ;;  %v1837_v51 = vpop.eup %1836  ;;  %v1916_v55 = vld [vmem:[%s3518_s0 + $0x1c0] sm:$0xff]  ;;  %v1920_v24 = vld [vmem:[%s3518_s0 + $0x1d8] sm:$0xff] }
 0x12d   :  { %vm557_vm3 = vcmp.eq.f32.partialorder %v3000_v46, 0.0  ;;  %1856 = vrcp.f32 %v813_v8  ;;  %v812_v35 = vmax.f32 %v538_v30, 1e-12  ;;  %v766_v19 = vsel %vm765_vm13, %v2959_v57, %v764_v27  ;;  %v1911_v57 = vld [vmem:[%s3518_s0 + $0xb8] sm:$0xff] }
 0x12e   :  { %v558_v36 = vand.u32 2147483648, %v3000_v46  ;;  %v1839_v60 = vpop.eup %1838  ;;  %v769_v10 = vsel %vm767_vm14, %v768_v63, %v766_v19  ;;  %vm548_vm4 = vcmp.eq.f32.partialorder %v3016_v4, inf  ;;  %vm550_vm5 = vcmp.eq.f32.partialorder %v3016_v4, 0.0  ;;  %v1917_v63 = vld [vmem:[%s3518_s0 + $0x1c8] sm:$0xff] }
 0x12f   :  { %1858 = vrsqrt.f32 %v3075_v34  ;;  %v1841_v32 = vpop.eup %1840  ;;  %v845_v37 = vmax.f32 %v769_v10, 1e-12  ;;  %v757_v6 = vmul.f32 %v1839_v60, %v2970_v22  ;;  %v893_v5 = vmul.f32 %v1910_v33, %v3010_v31  ;;  %v1914_v31 = vld [vmem:[%s3518_s0 + $0xc0] sm:$0xff]  ;;  %v1922_v19 = vld [vmem:[%s3518_s0 + $0xe8] sm:$0xff] }
 0x130   :  { %1860 = vrcp.f32 %v812_v35  ;;  %v1843_v61 = vpop.eup %1842  ;;  %v895_v16 = vmul.f32 %v1911_v57, %v3002_v0  ;;  %v957_v17 = vmul.f32 %v1912_v2, %v1827_v13  ;;  %v959_v47 = vmul.f32 %v1913_v40, %v3028_v52  ;;  %v1924_v2 = vld [vmem:[%s3518_s0 + $0x1e8] sm:$0xff] }
 0x131   :  { %v897_v11 = vmul.f32 %v1914_v31, %v1835_v25  ;;  %v1845_v14 = vpop.eup %1844  ;;  %1862 = vrcp.f32 %v845_v37  ;;  %v759_v0 = vsel %vm758_vm15, %v2970_v22, %v757_v6  ;;  %v554_v48 = vmul.f32 %v1843_v61, %v3000_v46  ;;  %v1921_v25 = vld [vmem:[%s3518_s0 + $0x1d0] sm:$0xff]  ;;  %v1923_v37 = vld [vmem:[%s3518_s0 + $0xe0] sm:$0xff] }
 0x132   :  { %v899_v49 = vmul.f32 %v1915_v26, %v1831_v58  ;;  %v1847_v53 = vpop.eup %1846  ;;  %v762_v52 = vsel %vm760_vm1, %v761_v41, %v759_v0  ;;  %v987_v28 = vpack.c.bf16 %v895_v16, %v893_v5  ;;  %v1003_v54 = vpack.c.bf16 %v959_v47, %v957_v17  ;;  %v1925_v47 = vld [vmem:[%s3518_s0 + $0x1e0] sm:$0xff]  ;;  %v1927_v26 = vld [vmem:[%s3518_s0 + $0xf0] sm:$0xff] }
 0x133   :  { %v961_v56 = vmul.f32 %v1916_v55, %v1841_v32  ;;  %v1849_v42 = vpop.eup %1848  ;;  %v844_v59 = vmax.f32 %v762_v52, 1e-12  ;;  %v556_v62 = vsel %vm555_vm2, %v3000_v46, %v554_v48  ;;  %v547_v13 = vmul.f32 %v1847_v53, %v3016_v4 }
 0x134   :  { %v988_v7 = vpack.c.bf16 %v899_v49, %v897_v11  ;;  %v559_v22 = vsel %vm557_vm3, %v558_v36, %v556_v62  ;;  %v551_v44 = vand.u32 2147483648, %v3016_v4  ;;  %1570 = vmatmul.mubr.msk.bf16.gmra.mxu0 %vm143_vm0, %v987_v28  ;;  %1602 = vmatmul.mubr.msk.bf16.gmra.mxu1 %vm143_vm0, %v1003_v54  ;;  %v963_v39 = vmul.f32 %v1917_v63, %v1837_v51  ;;  %v1928_v28 = vld [vmem:[%s3518_s0 + $0x1f8] sm:$0xff]  ;;  %v3196_v62 = vld [vmem:[%s3520_s2] ss:$0 sm:$0xff] }
 0x135   :  { %v901_v18 = vmul.f32 %v1918_v20, %v1849_v42  ;;  %1864 = vrcp.f32 %v844_v59  ;;  %v815_v50 = vmax.f32 %v559_v22, 1e-12  ;;  %v549_v46 = vsel %vm548_vm4, %v3016_v4, %v547_v13 }
 0x136   :  { %1573 = vmatprep.mubr.msk.bf16.mxu0 %vm143_vm0, %v988_v7  ;;  %v903_v12 = vmul.f32 %v1919_v29, %v1845_v14  ;;  %v552_v58 = vsel %vm550_vm5, %v551_v44, %v549_v46  ;;  %v1004_v9 = vpack.c.bf16 %v963_v39, %v961_v56  ;;  %vm779_vm6 = vcmp.eq.f32.partialorder %v3040_v38, inf  ;;  %v1926_v14 = vld [vmem:[%s3518_s0 + $0xf8] sm:$0xff]  ;;  %v1929_v56 = vld [vmem:[%s3518_s0 + $0x1f0] sm:$0xff] }
 0x137   :  { %v1851_v43 = vpop.eup %1850  ;;  %1866 = vrcp.f32 %v815_v50  ;;  %v814_v3 = vmax.f32 %v552_v58, 1e-12  ;;  %v782_v23 = vand.u32 2147483648, %v3040_v38  ;;  %vm781_vm7 = vcmp.eq.f32.partialorder %v3040_v38, 0.0 }
 0x138   :  { %v1853_v15 = vpop.eup %1852  ;;  %v778_v21 = vmul.f32 %v1851_v43, %v3040_v38  ;;  %1605 = vmatprep.mubr.msk.bf16.mxu1 %vm143_vm0, %v1004_v9  ;;  %v989_v45 = vpack.c.bf16 %v903_v12, %v901_v18  ;;  %vm772_vm8 = vcmp.eq.f32.partialorder %v3075_v34, inf  ;;  %v775_v32 = vand.u32 2147483648, %v3075_v34 }
 0x139   :  { %v967_v8 = vmul.f32 %v1920_v24, %v1853_v15  ;;  %v1855_v4 = vpop.eup %1854  ;;  %1868 = vrcp.f32 %v814_v3  ;;  %vm774_vm9 = vcmp.eq.f32.partialorder %v3075_v34, 0.0  ;;  %vm1411_vm10 = vcmask 261120  }
 0x13a   :  { %v780_v1 = vsel %vm779_vm6, %v3040_v38, %v778_v21  ;;  %v1857_v27 = vpop.eup %1856  ;;  %v965_v30 = vmul.f32 %v1921_v25, %v1855_v4 }
 0x13b   :  { %v783_v41 = vsel %vm781_vm7, %v782_v23, %v780_v1  ;;  %v907_v36 = vmul.f32 %v1922_v19, %v1857_v27 }
 0x13c   :  { %v1859_v51 = vpop.eup %1858  ;;  %v847_v35 = vmax.f32 %v783_v41, 1e-12  ;;  %1574 = vmatmul.mubr.msk.bf16.gmra.mxu0 %vm143_vm0, %v989_v45  ;;  %v1005_v38 = vpack.c.bf16 %v967_v8, %v965_v30 }
 0x13d   :  { %v1861_v60 = vpop.eup %1860  ;;  %v771_v10 = vmul.f32 %v1859_v51, %v3075_v34 }
 0x13e   :  { %v905_v6 = vmul.f32 %v1923_v37, %v1861_v60  ;;  %v1863_v33 = vpop.eup %1862  ;;  %1870 = vrcp.f32 %v847_v35  ;;  %1606 = vmatmul.mubr.msk.bf16.gmra.mxu1 %vm143_vm0, %v1005_v38 }
 0x13f   :  { %v773_v5 = vsel %vm772_vm8, %v3075_v34, %v771_v10  ;;  %v971_v17 = vmul.f32 %v1924_v2, %v1863_v33 }
 0x140   :  { %v776_v61 = vsel %vm774_vm9, %v775_v32, %v773_v5  ;;  %v990_v57 = vpack.c.bf16 %v907_v36, %v905_v6 }
 0x141   :  { %v846_v16 = vmax.f32 %v776_v61, 1e-12 }
 0x142   :  { %1577 = vmatprep.mubr.msk.bf16.mxu0 %vm143_vm0, %v990_v57  ;;  %v1865_v40 = vpop.eup %1864 }
 0x143   :  { %1872 = vrcp.f32 %v846_v16  ;;  %v969_v31 = vmul.f32 %v1925_v47, %v1865_v40 }
 0x144   :  { %v1867_v34 = vpop.eup %1866 }
 0x145   :  { %v1006_v11 = vpack.c.bf16 %v971_v17, %v969_v31  ;;  %v911_v0 = vmul.f32 %v1926_v14, %v1867_v34 }
 0x146   :  { %v1869_v48 = vpop.eup %1868 }
 0x147   :  { %1609 = vmatprep.mubr.msk.bf16.mxu1 %vm143_vm0, %v1006_v11  ;;  %v909_v49 = vmul.f32 %v1927_v26, %v1869_v48 }
 0x149   :  { %v991_v53 = vpack.c.bf16 %v911_v0, %v909_v49 }
 0x14b   :  { %v1871_v52 = vpop.eup %1870  ;;  %1578 = vmatmul.mubr.msk.bf16.gmra.mxu0 %vm143_vm0, %v991_v53 }
 0x14c   :  { %v975_v54 = vmul.f32 %v1928_v28, %v1871_v52 }
 0x150   :  { %v1873_v55 = vpop.eup %1872 }
 0x151   :  { %v973_v42 = vmul.f32 %v1929_v56, %v1873_v55 }
 0x153   :  { %v1007_v59 = vpack.c.bf16 %v975_v54, %v973_v42 }
 0x155   :  { %1610 = vmatmul.mubr.msk.bf16.gmra.mxu1 %vm143_vm0, %v1007_v59 }
 0x186   :  { %v1551_v13 = vpop.f32.mrf.mxu0 }
 0x187   :  { %v1165_v7 = vadd.f32 %v1551_v13, %v3196_v62 }
 0x188   :  { %v1156_v22 = vpop.f32.mrf.mxu0 }
 0x189   :  { %1414 = vst.msk [vmem:[%s3521_s3 + $0x10] sm:$0xff] %vm1411_vm10, %v1165_v7  ;;  %v1157_v44 = vadd.f32 %v3196_v62, %v1156_v22 }
 0x18a   :  { %v1552_v63 = vpop.f32.mrf.mxu0 }
 0x18b   :  { %1412 = vst.msk [vmem:[%s3521_s3] sm:$0xff] %vm1411_vm10, %v1157_v44  ;;  %v1168_v39 = vadd.f32 %v1552_v63, %v3196_v62 }
 0x18c   :  { %v1583_v20 = vpop.f32.mrf.mxu1  ;;  %v1159_v18 = vpop.f32.mrf.mxu0 }
 0x18d   :  { %1415 = vst.msk [vmem:[%s3521_s3 + $0x18] sm:$0xff] %vm1411_vm10, %v1168_v39  ;;  %v1293_v50 = vadd.f32 %v1583_v20, %v3196_v62  ;;  %v1160_v46 = vadd.f32 %v3196_v62, %v1159_v18 }
 0x18e   :  { %v1284_v29 = vpop.f32.mrf.mxu1 }
 0x18f   :  { %1446 = vst.msk [vmem:[%s3521_s3 + $0x110] sm:$0xff] %vm1411_vm10, %v1293_v50  ;;  %1413 = vst.msk [vmem:[%s3521_s3 + $0x8] sm:$0xff] %vm1411_vm10, %v1160_v46  ;;  %v1285_v12 = vadd.f32 %v3196_v62, %v1284_v29 }
 0x190   :  { %v1584_v43 = vpop.f32.mrf.mxu1 }
 0x191   :  { %1444 = vst.msk [vmem:[%s3521_s3 + $0x100] sm:$0xff] %vm1411_vm10, %v1285_v12  ;;  %v1296_v58 = vadd.f32 %v1584_v43, %v3196_v62 }
 0x192   :  { %v1287_v9 = vpop.f32.mrf.mxu1 }
 0x193   :  { %1447 = vst.msk [vmem:[%s3521_s3 + $0x118] sm:$0xff] %vm1411_vm10, %v1296_v58  ;;  %v1288_v15 = vadd.f32 %v3196_v62, %v1287_v9 }
 0x195   :  { %1445 = vst.msk [vmem:[%s3521_s3 + $0x108] sm:$0xff] %vm1411_vm10, %v1288_v15 }
 0x199   :  { %v1555_v3 = vpop.f32.mrf.mxu0 }
 0x19a   :  { %v1181_v21 = vadd.f32 %v1555_v3, %v3196_v62 }
 0x19b   :  { %v1172_v23 = vpop.f32.mrf.mxu0 }
 0x19c   :  { %1418 = vst.msk [vmem:[%s3521_s3 + $0x30] sm:$0xff] %vm1411_vm10, %v1181_v21  ;;  %v1173_v45 = vadd.f32 %v3196_v62, %v1172_v23 }
 0x19d   :  { %v1556_v24 = vpop.f32.mrf.mxu0  ;;  %v1587_v8 = vpop.f32.mrf.mxu1 }
 0x19e   :  { %1416 = vst.msk [vmem:[%s3521_s3 + $0x20] sm:$0xff] %vm1411_vm10, %v1173_v45  ;;  %v1184_v4 = vadd.f32 %v1556_v24, %v3196_v62  ;;  %v1309_v1 = vadd.f32 %v1587_v8, %v3196_v62 }
 0x19f   :  { %v1175_v27 = vpop.f32.mrf.mxu0  ;;  %v1300_v41 = vpop.f32.mrf.mxu1 }
 0x1a0   :  { %1419 = vst.msk [vmem:[%s3521_s3 + $0x38] sm:$0xff] %vm1411_vm10, %v1184_v4  ;;  %1450 = vst.msk [vmem:[%s3521_s3 + $0x130] sm:$0xff] %vm1411_vm10, %v1309_v1  ;;  %v1176_v25 = vadd.f32 %v3196_v62, %v1175_v27  ;;  %v1301_v30 = vadd.f32 %v3196_v62, %v1300_v41 }
 0x1a1   :  { %v1588_v51 = vpop.f32.mrf.mxu1 }
 0x1a2   :  { %1417 = vst.msk [vmem:[%s3521_s3 + $0x28] sm:$0xff] %vm1411_vm10, %v1176_v25  ;;  %1448 = vst.msk [vmem:[%s3521_s3 + $0x120] sm:$0xff] %vm1411_vm10, %v1301_v30  ;;  %v1312_v35 = vadd.f32 %v1588_v51, %v3196_v62 }
 0x1a3   :  { %v1303_v19 = vpop.f32.mrf.mxu1 }
 0x1a4   :  { %1451 = vst.msk [vmem:[%s3521_s3 + $0x138] sm:$0xff] %vm1411_vm10, %v1312_v35  ;;  %v1304_v36 = vadd.f32 %v3196_v62, %v1303_v19 }
 0x1a6   :  { %1449 = vst.msk [vmem:[%s3521_s3 + $0x128] sm:$0xff] %vm1411_vm10, %v1304_v36 }
 0x1b2   :  { %v1559_v60 = vpop.f32.mrf.mxu0 }
 0x1b3   :  { %v1197_v10 = vadd.f32 %v1559_v60, %v3196_v62 }
 0x1b4   :  { %v1188_v38 = vpop.f32.mrf.mxu0 }
 0x1b5   :  { %1422 = vst.msk [vmem:[%s3521_s3 + $0x50] sm:$0xff] %vm1411_vm10, %v1197_v10  ;;  %v1189_v32 = vadd.f32 %v3196_v62, %v1188_v38 }
 0x1b6   :  { %v1560_v37 = vpop.f32.mrf.mxu0  ;;  %v1591_v6 = vpop.f32.mrf.mxu1 }
 0x1b7   :  { %1420 = vst.msk [vmem:[%s3521_s3 + $0x40] sm:$0xff] %vm1411_vm10, %v1189_v32  ;;  %v1200_v33 = vadd.f32 %v1560_v37, %v3196_v62  ;;  %v1325_v5 = vadd.f32 %v1591_v6, %v3196_v62 }
 0x1b8   :  { %v1191_v61 = vpop.f32.mrf.mxu0  ;;  %v1316_v57 = vpop.f32.mrf.mxu1 }
 0x1b9   :  { %1423 = vst.msk [vmem:[%s3521_s3 + $0x58] sm:$0xff] %vm1411_vm10, %v1200_v33  ;;  %1454 = vst.msk [vmem:[%s3521_s3 + $0x150] sm:$0xff] %vm1411_vm10, %v1325_v5  ;;  %v1192_v16 = vadd.f32 %v3196_v62, %v1191_v61  ;;  %v1317_v2 = vadd.f32 %v3196_v62, %v1316_v57 }
 0x1ba   :  { %v1592_v17 = vpop.f32.mrf.mxu1 }
 0x1bb   :  { %1421 = vst.msk [vmem:[%s3521_s3 + $0x48] sm:$0xff] %vm1411_vm10, %v1192_v16  ;;  %1452 = vst.msk [vmem:[%s3521_s3 + $0x140] sm:$0xff] %vm1411_vm10, %v1317_v2  ;;  %v1328_v40 = vadd.f32 %v1592_v17, %v3196_v62 }
 0x1bc   :  { %v1319_v47 = vpop.f32.mrf.mxu1 }
 0x1bd   :  { %1455 = vst.msk [vmem:[%s3521_s3 + $0x158] sm:$0xff] %vm1411_vm10, %v1328_v40  ;;  %v1320_v31 = vadd.f32 %v3196_v62, %v1319_v47 }
 0x1bf   :  { %1453 = vst.msk [vmem:[%s3521_s3 + $0x148] sm:$0xff] %vm1411_vm10, %v1320_v31 }
 0x1c6   :  { %v1563_v34 = vpop.f32.mrf.mxu0 }
 0x1c7   :  { %v1213_v11 = vadd.f32 %v1563_v34, %v3196_v62 }
 0x1c8   :  { %v1204_v14 = vpop.f32.mrf.mxu0 }
 0x1c9   :  { %1426 = vst.msk [vmem:[%s3521_s3 + $0x70] sm:$0xff] %vm1411_vm10, %v1213_v11  ;;  %v1205_v0 = vadd.f32 %v3196_v62, %v1204_v14 }
 0x1ca   :  { %v1564_v48 = vpop.f32.mrf.mxu0 }
 0x1cb   :  { %1424 = vst.msk [vmem:[%s3521_s3 + $0x60] sm:$0xff] %vm1411_vm10, %v1205_v0  ;;  %v1216_v26 = vadd.f32 %v1564_v48, %v3196_v62 }
 0x1cc   :  { %v1207_v49 = vpop.f32.mrf.mxu0 }
 0x1cd   :  { %1427 = vst.msk [vmem:[%s3521_s3 + $0x78] sm:$0xff] %vm1411_vm10, %v1216_v26  ;;  %v1595_v53 = vpop.f32.mrf.mxu1  ;;  %v1208_v52 = vadd.f32 %v3196_v62, %v1207_v49 }
 0x1ce   :  { %v1341_v28 = vadd.f32 %v1595_v53, %v3196_v62 }
 0x1cf   :  { %1425 = vst.msk [vmem:[%s3521_s3 + $0x68] sm:$0xff] %vm1411_vm10, %v1208_v52  ;;  %v1332_v54 = vpop.f32.mrf.mxu1 }
 0x1d0   :  { %1458 = vst.msk [vmem:[%s3521_s3 + $0x170] sm:$0xff] %vm1411_vm10, %v1341_v28  ;;  %v1333_v55 = vadd.f32 %v3196_v62, %v1332_v54 }
 0x1d1   :  { %v1596_v56 = vpop.f32.mrf.mxu1 }
 0x1d2   :  { %1456 = vst.msk [vmem:[%s3521_s3 + $0x160] sm:$0xff] %vm1411_vm10, %v1333_v55  ;;  %v1344_v42 = vadd.f32 %v1596_v56, %v3196_v62 }
 0x1d3   :  { %v1335_v59 = vpop.f32.mrf.mxu1 }
 0x1d4   :  { %1459 = vst.msk [vmem:[%s3521_s3 + $0x178] sm:$0xff] %vm1411_vm10, %v1344_v42  ;;  %v1336_v13 = vadd.f32 %v3196_v62, %v1335_v59 }
 0x1d6   :  { %1457 = vst.msk [vmem:[%s3521_s3 + $0x168] sm:$0xff] %vm1411_vm10, %v1336_v13 }
 0x1dc   :  { %v1567_v7 = vpop.f32.mrf.mxu0 }
 0x1dd   :  { %v1229_v22 = vadd.f32 %v1567_v7, %v3196_v62 }
 0x1de   :  { %v1220_v44 = vpop.f32.mrf.mxu0 }
 0x1df   :  { %1430 = vst.msk [vmem:[%s3521_s3 + $0x90] sm:$0xff] %vm1411_vm10, %v1229_v22  ;;  %v1221_v63 = vadd.f32 %v3196_v62, %v1220_v44 }
 0x1e0   :  { %v1568_v39 = vpop.f32.mrf.mxu0 }
 0x1e1   :  { %v1599_v20 = vpop.f32.mrf.mxu1  ;;  %1428 = vst.msk [vmem:[%s3521_s3 + $0x80] sm:$0xff] %vm1411_vm10, %v1221_v63  ;;  %v1232_v18 = vadd.f32 %v1568_v39, %v3196_v62 }
 0x1e2   :  { %v1357_v50 = vadd.f32 %v1599_v20, %v3196_v62  ;;  %v1223_v46 = vpop.f32.mrf.mxu0 }
 0x1e3   :  { %v1348_v29 = vpop.f32.mrf.mxu1  ;;  %1431 = vst.msk [vmem:[%s3521_s3 + $0x98] sm:$0xff] %vm1411_vm10, %v1232_v18  ;;  %v1224_v12 = vadd.f32 %v3196_v62, %v1223_v46 }
 0x1e4   :  { %1462 = vst.msk [vmem:[%s3521_s3 + $0x190] sm:$0xff] %vm1411_vm10, %v1357_v50  ;;  %v1349_v43 = vadd.f32 %v3196_v62, %v1348_v29 }
 0x1e5   :  { %v1600_v58 = vpop.f32.mrf.mxu1  ;;  %1429 = vst.msk [vmem:[%s3521_s3 + $0x88] sm:$0xff] %vm1411_vm10, %v1224_v12 }
 0x1e6   :  { %1460 = vst.msk [vmem:[%s3521_s3 + $0x180] sm:$0xff] %vm1411_vm10, %v1349_v43  ;;  %v1360_v9 = vadd.f32 %v1600_v58, %v3196_v62 }
 0x1e7   :  { %v1351_v15 = vpop.f32.mrf.mxu1 }
 0x1e8   :  { %1463 = vst.msk [vmem:[%s3521_s3 + $0x198] sm:$0xff] %vm1411_vm10, %v1360_v9  ;;  %v1352_v3 = vadd.f32 %v3196_v62, %v1351_v15 }
 0x1ea   :  { %1461 = vst.msk [vmem:[%s3521_s3 + $0x188] sm:$0xff] %vm1411_vm10, %v1352_v3 }
 0x1f4   :  { %v1571_v21 = vpop.f32.mrf.mxu0  ;;  %v1603_v23 = vpop.f32.mrf.mxu1 }
 0x1f5   :  { %v1245_v45 = vadd.f32 %v1571_v21, %v3196_v62  ;;  %v1373_v24 = vadd.f32 %v1603_v23, %v3196_v62 }
 0x1f6   :  { %v1236_v8 = vpop.f32.mrf.mxu0  ;;  %v1364_v4 = vpop.f32.mrf.mxu1 }
 0x1f7   :  { %1434 = vst.msk [vmem:[%s3521_s3 + $0xb0] sm:$0xff] %vm1411_vm10, %v1245_v45  ;;  %v1237_v1 = vadd.f32 %v3196_v62, %v1236_v8  ;;  %1466 = vst.msk [vmem:[%s3521_s3 + $0x1b0] sm:$0xff] %vm1411_vm10, %v1373_v24  ;;  %v1365_v27 = vadd.f32 %v3196_v62, %v1364_v4 }
 0x1f8   :  { %v1572_v41 = vpop.f32.mrf.mxu0  ;;  %v1604_v25 = vpop.f32.mrf.mxu1 }
 0x1f9   :  { %1432 = vst.msk [vmem:[%s3521_s3 + $0xa0] sm:$0xff] %vm1411_vm10, %v1237_v1  ;;  %v1248_v30 = vadd.f32 %v1572_v41, %v3196_v62  ;;  %1464 = vst.msk [vmem:[%s3521_s3 + $0x1a0] sm:$0xff] %vm1411_vm10, %v1365_v27  ;;  %v1376_v51 = vadd.f32 %v1604_v25, %v3196_v62 }
 0x1fa   :  { %v1239_v35 = vpop.f32.mrf.mxu0  ;;  %v1367_v19 = vpop.f32.mrf.mxu1 }
 0x1fb   :  { %1435 = vst.msk [vmem:[%s3521_s3 + $0xb8] sm:$0xff] %vm1411_vm10, %v1248_v30  ;;  %v1240_v36 = vadd.f32 %v3196_v62, %v1239_v35  ;;  %1467 = vst.msk [vmem:[%s3521_s3 + $0x1b8] sm:$0xff] %vm1411_vm10, %v1376_v51  ;;  %v1368_v60 = vadd.f32 %v3196_v62, %v1367_v19 }
 0x1fc   :  { %v1575_v10 = vpop.f32.mrf.mxu0 }
 0x1fd   :  { %1433 = vst.msk [vmem:[%s3521_s3 + $0xa8] sm:$0xff] %vm1411_vm10, %v1240_v36  ;;  %1465 = vst.msk [vmem:[%s3521_s3 + $0x1a8] sm:$0xff] %vm1411_vm10, %v1368_v60  ;;  %v1261_v38 = vadd.f32 %v1575_v10, %v3196_v62 }
 0x1fe   :  { %v1252_v32 = vpop.f32.mrf.mxu0  ;;  %v1607_v37 = vpop.f32.mrf.mxu1 }
 0x1ff   :  { %1438 = vst.msk [vmem:[%s3521_s3 + $0xd0] sm:$0xff] %vm1411_vm10, %v1261_v38  ;;  %v1253_v6 = vadd.f32 %v3196_v62, %v1252_v32  ;;  %v1389_v33 = vadd.f32 %v1607_v37, %v3196_v62 }
 0x200   :  { %v1576_v5 = vpop.f32.mrf.mxu0  ;;  %v1380_v61 = vpop.f32.mrf.mxu1 }
 0x201   :  { %1436 = vst.msk [vmem:[%s3521_s3 + $0xc0] sm:$0xff] %vm1411_vm10, %v1253_v6  ;;  %v1264_v57 = vadd.f32 %v1576_v5, %v3196_v62  ;;  %1470 = vst.msk [vmem:[%s3521_s3 + $0x1d0] sm:$0xff] %vm1411_vm10, %v1389_v33  ;;  %v1381_v16 = vadd.f32 %v3196_v62, %v1380_v61 }
 0x202   :  { %v1255_v2 = vpop.f32.mrf.mxu0  ;;  %v1608_v17 = vpop.f32.mrf.mxu1 }
 0x203   :  { %1439 = vst.msk [vmem:[%s3521_s3 + $0xd8] sm:$0xff] %vm1411_vm10, %v1264_v57  ;;  %v1256_v40 = vadd.f32 %v3196_v62, %v1255_v2  ;;  %1468 = vst.msk [vmem:[%s3521_s3 + $0x1c0] sm:$0xff] %vm1411_vm10, %v1381_v16  ;;  %v1392_v47 = vadd.f32 %v1608_v17, %v3196_v62 }
 0x204   :  { %v1383_v31 = vpop.f32.mrf.mxu1 }
 0x205   :  { %1437 = vst.msk [vmem:[%s3521_s3 + $0xc8] sm:$0xff] %vm1411_vm10, %v1256_v40  ;;  %1471 = vst.msk [vmem:[%s3521_s3 + $0x1d8] sm:$0xff] %vm1411_vm10, %v1392_v47  ;;  %v1384_v34 = vadd.f32 %v3196_v62, %v1383_v31 }
 0x207   :  { %1469 = vst.msk [vmem:[%s3521_s3 + $0x1c8] sm:$0xff] %vm1411_vm10, %v1384_v34 }
 0x20b   :  { %v1579_v11 = vpop.f32.mrf.mxu0 }
 0x20c   :  { %v1277_v14 = vadd.f32 %v1579_v11, %v3196_v62 }
 0x20d   :  { %v1268_v0 = vpop.f32.mrf.mxu0 }
 0x20e   :  { %1442 = vst.msk [vmem:[%s3521_s3 + $0xf0] sm:$0xff] %vm1411_vm10, %v1277_v14  ;;  %v1269_v48 = vadd.f32 %v3196_v62, %v1268_v0 }
 0x20f   :  { %v1580_v26 = vpop.f32.mrf.mxu0 }
 0x210   :  { %1440 = vst.msk [vmem:[%s3521_s3 + $0xe0] sm:$0xff] %vm1411_vm10, %v1269_v48  ;;  %v1280_v49 = vadd.f32 %v1580_v26, %v3196_v62 }
 0x211   :  { %v1271_v53 = vpop.f32.mrf.mxu0 }
 0x212   :  { %1443 = vst.msk [vmem:[%s3521_s3 + $0xf8] sm:$0xff] %vm1411_vm10, %v1280_v49  ;;  %v1272_v52 = vadd.f32 %v3196_v62, %v1271_v53 }
 0x214   :  { %1441 = vst.msk [vmem:[%s3521_s3 + $0xe8] sm:$0xff] %vm1411_vm10, %v1272_v52 }
 0x215   :  { %v1611_v28 = vpop.f32.mrf.mxu1 }
 0x216   :  { %v1405_v54 = vadd.f32 %v1611_v28, %v3196_v62 }
 0x217   :  { %v1396_v55 = vpop.f32.mrf.mxu1 }
 0x218   :  { %1474 = vst.msk [vmem:[%s3521_s3 + $0x1f0] sm:$0xff] %vm1411_vm10, %v1405_v54  ;;  %v1397_v56 = vadd.f32 %v3196_v62, %v1396_v55 }
 0x219   :  { %v1612_v42 = vpop.f32.mrf.mxu1 }
 0x21a   :  { %1472 = vst.msk [vmem:[%s3521_s3 + $0x1e0] sm:$0xff] %vm1411_vm10, %v1397_v56  ;;  %v1408_v59 = vadd.f32 %v1612_v42, %v3196_v62 }
 0x21b   :  { %v1399_v13 = vpop.f32.mrf.mxu1 }
 0x21c   :  { %1475 = vst.msk [vmem:[%s3521_s3 + $0x1f8] sm:$0xff] %vm1411_vm10, %v1408_v59  ;;  %v1400_v7 = vadd.f32 %v3196_v62, %v1399_v13 }
 0x21e   :  { %1473 = vst.msk [vmem:[%s3521_s3 + $0x1e8] sm:$0xff] %vm1411_vm10, %v1400_v7 }

</bundles_post_ra>
